<compile_context>
chip_gen: v5e
topology: v5e:2x2
jax: 0.10.0
libtpu: 0.0.40
codegen_flags: <defaults>
</compile_context>

<pallas_src>
import functools

import jax
import jax.numpy as jnp
from jax import lax
from jax.experimental import pallas as pl
from jax.experimental.pallas import tpu as pltpu


def _conv_bn_relu_kernel(x_ref, w_ref, scale_ref, shift_ref, o_ref, *scratch,
                         ks, stride, pad, h_out, w_out,
                         apply_bn, apply_relu, residual):
    # x_ref:     (1, H, W, Cin)        one image, NHWC (channels on lanes)
    # w_ref:     (ks*ks, Cin, Cout)    conv taps, tap index = kh*ks + kw
    # scale_ref: (1, Cout)             folded BN scale  (gamma * rsqrt(var+eps))
    # shift_ref: (1, Cout)             folded BN shift  (beta - mean*scale)
    # o_ref:     (1, H_out*W_out, Cout)
    h_in, w_in, cin = x_ref.shape[1], x_ref.shape[2], x_ref.shape[3]
    cout = o_ref.shape[-1]

    x_img = x_ref[0]                                  # (H, W, Cin)

    if pad > 0:
        # Halo padding entirely in VMEM (no HBM pad pass in the wrapper).
        xp_ref = scratch[0]
        xp_ref[...] = jnp.zeros(xp_ref.shape, xp_ref.dtype)
        xp_ref[pad:pad + h_in, pad:pad + w_in, :] = x_img
        x_src = xp_ref[...]                           # (H+2p, W+2p, Cin)
    else:
        x_src = x_img

    acc = jnp.zeros((h_out * w_out, cout), jnp.float32)
    # kw outer: one sublane (W) shift per kw; kh inner slice is outer-dim (free).
    for kw in range(ks):                              # static unroll (ks small)
        if stride == 1:
            x_kw = x_src[:, kw:kw + w_out, :]         # (H_src, W_out, Cin)
        for kh in range(ks):
            k = kh * ks + kw
            if stride == 1:
                win = x_kw[kh:kh + h_out]             # (H_out, W_out, Cin)
            else:
                # TODO(synk): strided windows (stride > 1) — not exercised here.
                win = lax.slice(
                    x_src, (kh, kw, 0),
                    (kh + (h_out - 1) * stride + 1,
                     kw + (w_out - 1) * stride + 1, cin),
                    (stride, stride, 1))
            win2 = win.reshape(h_out * w_out, cin).astype(jnp.float32)
            acc = acc + jnp.dot(win2, w_ref[k].astype(jnp.float32),
                                preferred_element_type=jnp.float32)

    y = acc
    if apply_bn:
        y = y * scale_ref[...].astype(jnp.float32) + shift_ref[...].astype(jnp.float32)
    if apply_relu:
        y = jnp.maximum(y, 0.0)
    if residual:
        # res=True implies stride==1 and Cin==Cout, so x itself is the residual.
        y = y + x_img.reshape(h_in * w_in, cin).astype(jnp.float32)
    o_ref[0] = y.astype(o_ref.dtype)


def conv_bn_relu(x, weight, *, stride=1, norm=True, res=False,
                 gamma=None, beta=None, running_mean=None, running_var=None,
                 eps=1e-5):
    """Forward of ConvBNReLU. x: NCHW, weight: OIHW (PyTorch layouts)."""
    n, cin, h, w_sp = x.shape
    cout, cin_w, ks, ks2 = weight.shape
    assert cin_w == cin and ks == ks2
    pad = ks // 2
    h_out = (h + 2 * pad - ks) // stride + 1
    w_out = (w_sp + 2 * pad - ks) // stride + 1
    if res:
        assert stride == 1 and cin == cout and h_out == h and w_out == w_sp

    # Fold eval-mode BatchNorm into a per-channel scale/shift epilogue.
    if norm:
        scale = gamma.astype(jnp.float32) * lax.rsqrt(running_var.astype(jnp.float32) + eps)
        shift = beta.astype(jnp.float32) - running_mean.astype(jnp.float32) * scale
    else:
        scale = jnp.ones((cout,), jnp.float32)
        shift = jnp.zeros((cout,), jnp.float32)
    scale2 = scale.reshape(1, cout)
    shift2 = shift.reshape(1, cout)

    x_nhwc = jnp.transpose(x, (0, 2, 3, 1))                       # interface glue
    w_kio = jnp.transpose(weight, (2, 3, 1, 0)).reshape(ks * ks, cin, cout)

    scratch_shapes = []
    if pad > 0:
        scratch_shapes.append(
            pltpu.VMEM((h + 2 * pad, w_sp + 2 * pad, cin), x_nhwc.dtype))

    kernel = functools.partial(
        _conv_bn_relu_kernel,
        ks=ks, stride=stride, pad=pad, h_out=h_out, w_out=w_out,
        apply_bn=norm, apply_relu=norm, residual=res)

    out = pl.pallas_call(
        kernel,
        out_shape=jax.ShapeDtypeStruct((n, h_out * w_out, cout), x.dtype),
        grid=(n,),
        in_specs=[
            pl.BlockSpec((1, h, w_sp, cin), lambda i: (i, 0, 0, 0)),
            pl.BlockSpec((ks * ks, cin, cout), lambda i: (0, 0, 0)),
            pl.BlockSpec((1, cout), lambda i: (0, 0)),
            pl.BlockSpec((1, cout), lambda i: (0, 0)),
        ],
        out_specs=pl.BlockSpec((1, h_out * w_out, cout), lambda i: (i, 0, 0)),
        scratch_shapes=scratch_shapes,
        compiler_params=pltpu.CompilerParams(dimension_semantics=("parallel",)),
    )(x_nhwc, w_kio, scale2, shift2)

    out_nhwc = out.reshape(n, h_out, w_out, cout)
    return jnp.transpose(out_nhwc, (0, 3, 1, 2))                  # back to NCHW


def _reference(x, w, stride, norm, res, gamma, beta, mean, var, eps):
    ks = w.shape[-1]
    pad = ks // 2
    y = lax.conv_general_dilated(
        x, w, (stride, stride), [(pad, pad), (pad, pad)],
        dimension_numbers=("NCHW", "OIHW", "NCHW"),
        precision=lax.Precision.HIGHEST)
    if norm:
        y = (y - mean[None, :, None, None]) * lax.rsqrt(var[None, :, None, None] + eps) \
            * gamma[None, :, None, None] + beta[None, :, None, None]
        y = jnp.maximum(y, 0.0)
    if res:
        y = x + y
    return y


if __name__ == "__main__":
    key = jax.random.PRNGKey(0)
    ks_ = jax.random.split(key, 12)
    eps = 1e-5

    x = jax.random.normal(ks_[0], (2, 4, 16, 16), jnp.float32)

    # Case A: ConvBNReLU(in_c=4, out_c=8, ks=3, stride=1, norm=True, res=False)
    w_a = jax.random.normal(ks_[1], (8, 4, 3, 3), jnp.float32) * 0.2
    g_a = 1.0 + 0.1 * jax.random.normal(ks_[2], (8,), jnp.float32)
    b_a = 0.1 * jax.random.normal(ks_[3], (8,), jnp.float32)
    m_a = 0.1 * jax.random.normal(ks_[4], (8,), jnp.float32)
    v_a = jax.random.uniform(ks_[5], (8,), jnp.float32, minval=0.5, maxval=1.5)
    y_a = conv_bn_relu(x, w_a, stride=1, norm=True, res=False,
                       gamma=g_a, beta=b_a, running_mean=m_a, running_var=v_a, eps=eps)

    # Case B: ConvBNReLU(in_c=4, out_c=4, ks=3, stride=1, norm=True, res=True)
    w_b = jax.random.normal(ks_[6], (4, 4, 3, 3), jnp.float32) * 0.2
    g_b = 1.0 + 0.1 * jax.random.normal(ks_[7], (4,), jnp.float32)
    b_b = 0.1 * jax.random.normal(ks_[8], (4,), jnp.float32)
    m_b = 0.1 * jax.random.normal(ks_[9], (4,), jnp.float32)
    v_b = jax.random.uniform(ks_[10], (4,), jnp.float32, minval=0.5, maxval=1.5)
    y_b = conv_bn_relu(x, w_b, stride=1, norm=True, res=True,
                       gamma=g_b, beta=b_b, running_mean=m_b, running_var=v_b, eps=eps)

    # Case C: ConvBNReLU(in_c=4, out_c=8, ks=1, norm=False) -> plain conv
    w_c = jax.random.normal(ks_[11], (8, 4, 1, 1), jnp.float32) * 0.3
    y_c = conv_bn_relu(x, w_c, stride=1, norm=False, res=False)

    jax.block_until_ready((y_a, y_b, y_c))

    r_a = _reference(x, w_a, 1, True, False, g_a, b_a, m_a, v_a, eps)
    r_b = _reference(x, w_b, 1, True, True, g_b, b_b, m_b, v_b, eps)
    r_c = _reference(x, w_c, 1, False, False, None, None, None, None, eps)

    # Loose-ish tolerance: the MXU's default f32 matmul precision may be reduced
    # relative to the HIGHEST-precision XLA reference; semantic/indexing bugs
    # would produce errors orders of magnitude above this threshold.
    assert bool(jnp.allclose(y_a, r_a, atol=2e-2, rtol=2e-2))
    assert bool(jnp.allclose(y_b, r_b, atol=2e-2, rtol=2e-2))
    assert bool(jnp.allclose(y_c, r_c, atol=2e-2, rtol=2e-2))

    print("KERNEL_OK")
</pallas_src>

<mosaic_0001>
module attributes {stable_mosaic.version = 11 : i64} {
  func.func @_conv_bn_relu_kernel(%arg0: i32, %arg1: memref<1x16x16x4xf32, #tpu.memory_space<vmem>>, %arg2: memref<9x4x8xf32, #tpu.memory_space<vmem>>, %arg3: memref<1x8xf32, #tpu.memory_space<vmem>>, %arg4: memref<1x8xf32, #tpu.memory_space<vmem>>, %arg5: memref<1x256x8xf32, #tpu.memory_space<vmem>>, %arg6: memref<18x18x4xf32, #tpu.memory_space<vmem>>) attributes {dimension_semantics = [#tpu.dimension_semantics<parallel>], iteration_bounds = array<i64: 2>, scalar_prefetch = 0 : i64, scratch_operands = 1 : i64, tpu.core_type = #tpu.core_type<tc>, window_params = [{transform_indices = @transform_0, window_bounds = array<i64: 1, 16, 16, 4>}, {pipeline_mode = #tpu.pipeline_mode<synchronous>, transform_indices = @transform_1, window_bounds = array<i64: 9, 4, 8>}, {pipeline_mode = #tpu.pipeline_mode<synchronous>, transform_indices = @transform_2, window_bounds = array<i64: 1, 8>}, {pipeline_mode = #tpu.pipeline_mode<synchronous>, transform_indices = @transform_3, window_bounds = array<i64: 1, 8>}, {transform_indices = @transform_4, window_bounds = array<i64: 1, 256, 8>}]} {
    %c0 = arith.constant 0 : index
    %c0_0 = arith.constant 0 : index
    %c0_1 = arith.constant 0 : index
    %c0_2 = arith.constant 0 : index
    %0 = vector.load %arg1[%c0, %c0_0, %c0_1, %c0_2] : memref<1x16x16x4xf32, #tpu.memory_space<vmem>>, vector<1x16x16x4xf32>
    %1 = vector.shape_cast %0 : vector<1x16x16x4xf32> to vector<16x16x4xf32>
    %cst = arith.constant 0.000000e+00 : f32
    %2 = vector.broadcast %cst : f32 to vector<18x18x4xf32>
    %c0_3 = arith.constant 0 : index
    %c0_4 = arith.constant 0 : index
    %c0_5 = arith.constant 0 : index
    %3 = vector.load %arg6[%c0_3, %c0_4, %c0_5] : memref<18x18x4xf32, #tpu.memory_space<vmem>>, vector<18x18x4xf32>
    tpu.vector_store %arg6[%c0_3, %c0_4, %c0_5], %2 {strides = array<i32>} : memref<18x18x4xf32, #tpu.memory_space<vmem>>, vector<18x18x4xf32>,
    %c1 = arith.constant 1 : index
    %c1_6 = arith.constant 1 : index
    %c0_7 = arith.constant 0 : index
    %4 = vector.load %arg6[%c1, %c1_6, %c0_7] : memref<18x18x4xf32, #tpu.memory_space<vmem>>, vector<16x16x4xf32>
    tpu.vector_store %arg6[%c1, %c1_6, %c0_7], %1 {strides = array<i32>} : memref<18x18x4xf32, #tpu.memory_space<vmem>>, vector<16x16x4xf32>,
    %c0_8 = arith.constant 0 : index
    %c0_9 = arith.constant 0 : index
    %c0_10 = arith.constant 0 : index
    %5 = vector.load %arg6[%c0_8, %c0_9, %c0_10] : memref<18x18x4xf32, #tpu.memory_space<vmem>>, vector<18x18x4xf32>
    %cst_11 = arith.constant 0.000000e+00 : f32
    %6 = vector.broadcast %cst_11 : f32 to vector<256x8xf32>
    %7 = vector.extract_strided_slice %5 {offsets = [0, 0, 0], sizes = [18, 16, 4], strides = [1, 1, 1]} : vector<18x18x4xf32> to vector<18x16x4xf32>
    %8 = vector.extract_strided_slice %7 {offsets = [0, 0, 0], sizes = [16, 16, 4], strides = [1, 1, 1]} : vector<18x16x4xf32> to vector<16x16x4xf32>
    %9 = vector.shape_cast %8 : vector<16x16x4xf32> to vector<256x4xf32>
    %c0_12 = arith.constant 0 : index
    %c0_13 = arith.constant 0 : index
    %c0_14 = arith.constant 0 : index
    %10 = vector.load %arg2[%c0_12, %c0_13, %c0_14] : memref<9x4x8xf32, #tpu.memory_space<vmem>>, vector<1x4x8xf32>
    %11 = vector.shape_cast %10 : vector<1x4x8xf32> to vector<4x8xf32>
    %cst_15 = arith.constant dense<0.000000e+00> : vector<256x8xf32>
    %12 = tpu.matmul %9, %11, %cst_15 {dimension_numbers = #tpu.dot_dimension_numbers<[1], [0], [0], [1], [0, 0, 1, 1], [], []>} : vector<256x4xf32>, vector<4x8xf32>, vector<256x8xf32> -> vector<256x8xf32>
    %13 = arith.addf %6, %12 : vector<256x8xf32>
    %14 = vector.extract_strided_slice %7 {offsets = [1, 0, 0], sizes = [16, 16, 4], strides = [1, 1, 1]} : vector<18x16x4xf32> to vector<16x16x4xf32>
    %15 = vector.shape_cast %14 : vector<16x16x4xf32> to vector<256x4xf32>
    %c3 = arith.constant 3 : index
    %c0_16 = arith.constant 0 : index
    %c0_17 = arith.constant 0 : index
    %16 = vector.load %arg2[%c3, %c0_16, %c0_17] : memref<9x4x8xf32, #tpu.memory_space<vmem>>, vector<1x4x8xf32>
    %17 = vector.shape_cast %16 : vector<1x4x8xf32> to vector<4x8xf32>
    %cst_18 = arith.constant dense<0.000000e+00> : vector<256x8xf32>
    %18 = tpu.matmul %15, %17, %cst_18 {dimension_numbers = #tpu.dot_dimension_numbers<[1], [0], [0], [1], [0, 0, 1, 1], [], []>} : vector<256x4xf32>, vector<4x8xf32>, vector<256x8xf32> -> vector<256x8xf32>
    %19 = arith.addf %13, %18 : vector<256x8xf32>
    %20 = vector.extract_strided_slice %7 {offsets = [2, 0, 0], sizes = [16, 16, 4], strides = [1, 1, 1]} : vector<18x16x4xf32> to vector<16x16x4xf32>
    %21 = vector.shape_cast %20 : vector<16x16x4xf32> to vector<256x4xf32>
    %c6 = arith.constant 6 : index
    %c0_19 = arith.constant 0 : index
    %c0_20 = arith.constant 0 : index
    %22 = vector.load %arg2[%c6, %c0_19, %c0_20] : memref<9x4x8xf32, #tpu.memory_space<vmem>>, vector<1x4x8xf32>
    %23 = vector.shape_cast %22 : vector<1x4x8xf32> to vector<4x8xf32>
    %cst_21 = arith.constant dense<0.000000e+00> : vector<256x8xf32>
    %24 = tpu.matmul %21, %23, %cst_21 {dimension_numbers = #tpu.dot_dimension_numbers<[1], [0], [0], [1], [0, 0, 1, 1], [], []>} : vector<256x4xf32>, vector<4x8xf32>, vector<256x8xf32> -> vector<256x8xf32>
    %25 = arith.addf %19, %24 : vector<256x8xf32>
    %26 = vector.extract_strided_slice %5 {offsets = [0, 1, 0], sizes = [18, 16, 4], strides = [1, 1, 1]} : vector<18x18x4xf32> to vector<18x16x4xf32>
    %27 = vector.extract_strided_slice %26 {offsets = [0, 0, 0], sizes = [16, 16, 4], strides = [1, 1, 1]} : vector<18x16x4xf32> to vector<16x16x4xf32>
    %28 = vector.shape_cast %27 : vector<16x16x4xf32> to vector<256x4xf32>
    %c1_22 = arith.constant 1 : index
    %c0_23 = arith.constant 0 : index
    %c0_24 = arith.constant 0 : index
    %29 = vector.load %arg2[%c1_22, %c0_23, %c0_24] : memref<9x4x8xf32, #tpu.memory_space<vmem>>, vector<1x4x8xf32>
    %30 = vector.shape_cast %29 : vector<1x4x8xf32> to vector<4x8xf32>
    %cst_25 = arith.constant dense<0.000000e+00> : vector<256x8xf32>
    %31 = tpu.matmul %28, %30, %cst_25 {dimension_numbers = #tpu.dot_dimension_numbers<[1], [0], [0], [1], [0, 0, 1, 1], [], []>} : vector<256x4xf32>, vector<4x8xf32>, vector<256x8xf32> -> vector<256x8xf32>
    %32 = arith.addf %25, %31 : vector<256x8xf32>
    %33 = vector.extract_strided_slice %26 {offsets = [1, 0, 0], sizes = [16, 16, 4], strides = [1, 1, 1]} : vector<18x16x4xf32> to vector<16x16x4xf32>
    %34 = vector.shape_cast %33 : vector<16x16x4xf32> to vector<256x4xf32>
    %c4 = arith.constant 4 : index
    %c0_26 = arith.constant 0 : index
    %c0_27 = arith.constant 0 : index
    %35 = vector.load %arg2[%c4, %c0_26, %c0_27] : memref<9x4x8xf32, #tpu.memory_space<vmem>>, vector<1x4x8xf32>
    %36 = vector.shape_cast %35 : vector<1x4x8xf32> to vector<4x8xf32>
    %cst_28 = arith.constant dense<0.000000e+00> : vector<256x8xf32>
    %37 = tpu.matmul %34, %36, %cst_28 {dimension_numbers = #tpu.dot_dimension_numbers<[1], [0], [0], [1], [0, 0, 1, 1], [], []>} : vector<256x4xf32>, vector<4x8xf32>, vector<256x8xf32> -> vector<256x8xf32>
    %38 = arith.addf %32, %37 : vector<256x8xf32>
    %39 = vector.extract_strided_slice %26 {offsets = [2, 0, 0], sizes = [16, 16, 4], strides = [1, 1, 1]} : vector<18x16x4xf32> to vector<16x16x4xf32>
    %40 = vector.shape_cast %39 : vector<16x16x4xf32> to vector<256x4xf32>
    %c7 = arith.constant 7 : index
    %c0_29 = arith.constant 0 : index
    %c0_30 = arith.constant 0 : index
    %41 = vector.load %arg2[%c7, %c0_29, %c0_30] : memref<9x4x8xf32, #tpu.memory_space<vmem>>, vector<1x4x8xf32>
    %42 = vector.shape_cast %41 : vector<1x4x8xf32> to vector<4x8xf32>
    %cst_31 = arith.constant dense<0.000000e+00> : vector<256x8xf32>
    %43 = tpu.matmul %40, %42, %cst_31 {dimension_numbers = #tpu.dot_dimension_numbers<[1], [0], [0], [1], [0, 0, 1, 1], [], []>} : vector<256x4xf32>, vector<4x8xf32>, vector<256x8xf32> -> vector<256x8xf32>
    %44 = arith.addf %38, %43 : vector<256x8xf32>
    %45 = vector.extract_strided_slice %5 {offsets = [0, 2, 0], sizes = [18, 16, 4], strides = [1, 1, 1]} : vector<18x18x4xf32> to vector<18x16x4xf32>
    %46 = vector.extract_strided_slice %45 {offsets = [0, 0, 0], sizes = [16, 16, 4], strides = [1, 1, 1]} : vector<18x16x4xf32> to vector<16x16x4xf32>
    %47 = vector.shape_cast %46 : vector<16x16x4xf32> to vector<256x4xf32>
    %c2 = arith.constant 2 : index
    %c0_32 = arith.constant 0 : index
    %c0_33 = arith.constant 0 : index
    %48 = vector.load %arg2[%c2, %c0_32, %c0_33] : memref<9x4x8xf32, #tpu.memory_space<vmem>>, vector<1x4x8xf32>
    %49 = vector.shape_cast %48 : vector<1x4x8xf32> to vector<4x8xf32>
    %cst_34 = arith.constant dense<0.000000e+00> : vector<256x8xf32>
    %50 = tpu.matmul %47, %49, %cst_34 {dimension_numbers = #tpu.dot_dimension_numbers<[1], [0], [0], [1], [0, 0, 1, 1], [], []>} : vector<256x4xf32>, vector<4x8xf32>, vector<256x8xf32> -> vector<256x8xf32>
    %51 = arith.addf %44, %50 : vector<256x8xf32>
    %52 = vector.extract_strided_slice %45 {offsets = [1, 0, 0], sizes = [16, 16, 4], strides = [1, 1, 1]} : vector<18x16x4xf32> to vector<16x16x4xf32>
    %53 = vector.shape_cast %52 : vector<16x16x4xf32> to vector<256x4xf32>
    %c5 = arith.constant 5 : index
    %c0_35 = arith.constant 0 : index
    %c0_36 = arith.constant 0 : index
    %54 = vector.load %arg2[%c5, %c0_35, %c0_36] : memref<9x4x8xf32, #tpu.memory_space<vmem>>, vector<1x4x8xf32>
    %55 = vector.shape_cast %54 : vector<1x4x8xf32> to vector<4x8xf32>
    %cst_37 = arith.constant dense<0.000000e+00> : vector<256x8xf32>
    %56 = tpu.matmul %53, %55, %cst_37 {dimension_numbers = #tpu.dot_dimension_numbers<[1], [0], [0], [1], [0, 0, 1, 1], [], []>} : vector<256x4xf32>, vector<4x8xf32>, vector<256x8xf32> -> vector<256x8xf32>
    %57 = arith.addf %51, %56 : vector<256x8xf32>
    %58 = vector.extract_strided_slice %45 {offsets = [2, 0, 0], sizes = [16, 16, 4], strides = [1, 1, 1]} : vector<18x16x4xf32> to vector<16x16x4xf32>
    %59 = vector.shape_cast %58 : vector<16x16x4xf32> to vector<256x4xf32>
    %c8 = arith.constant 8 : index
    %c0_38 = arith.constant 0 : index
    %c0_39 = arith.constant 0 : index
    %60 = vector.load %arg2[%c8, %c0_38, %c0_39] : memref<9x4x8xf32, #tpu.memory_space<vmem>>, vector<1x4x8xf32>
    %61 = vector.shape_cast %60 : vector<1x4x8xf32> to vector<4x8xf32>
    %cst_40 = arith.constant dense<0.000000e+00> : vector<256x8xf32>
    %62 = tpu.matmul %59, %61, %cst_40 {dimension_numbers = #tpu.dot_dimension_numbers<[1], [0], [0], [1], [0, 0, 1, 1], [], []>} : vector<256x4xf32>, vector<4x8xf32>, vector<256x8xf32> -> vector<256x8xf32>
    %63 = arith.addf %57, %62 : vector<256x8xf32>
    %c0_41 = arith.constant 0 : index
    %c0_42 = arith.constant 0 : index
    %64 = vector.load %arg3[%c0_41, %c0_42] : memref<1x8xf32, #tpu.memory_space<vmem>>, vector<1x8xf32>
    %65 = vector.broadcast %64 : vector<1x8xf32> to vector<256x8xf32>
    %66 = arith.mulf %63, %65 : vector<256x8xf32>
    %c0_43 = arith.constant 0 : index
    %c0_44 = arith.constant 0 : index
    %67 = vector.load %arg4[%c0_43, %c0_44] : memref<1x8xf32, #tpu.memory_space<vmem>>, vector<1x8xf32>
    %68 = vector.broadcast %67 : vector<1x8xf32> to vector<256x8xf32>
    %69 = arith.addf %66, %68 : vector<256x8xf32>
    %cst_45 = arith.constant 0.000000e+00 : f32
    %70 = vector.broadcast %cst_45 : f32 to vector<256x8xf32>
    %71 = arith.maximumf %69, %70 : vector<256x8xf32>
    %c0_46 = arith.constant 0 : index
    %c0_47 = arith.constant 0 : index
    %c0_48 = arith.constant 0 : index
    %72 = vector.load %arg5[%c0_46, %c0_47, %c0_48] : memref<1x256x8xf32, #tpu.memory_space<vmem>>, vector<1x256x8xf32>
    %73 = vector.shape_cast %72 : vector<1x256x8xf32> to vector<256x8xf32>
    %74 = vector.shape_cast %71 : vector<256x8xf32> to vector<1x256x8xf32>
    tpu.vector_store %arg5[%c0_46, %c0_47, %c0_48], %74 {strides = array<i32>} : memref<1x256x8xf32, #tpu.memory_space<vmem>>, vector<1x256x8xf32>,
    return
  }
  func.func @transform_0(%arg0: i32) -> (i32, i32, i32, i32) {
    %c0_i32 = arith.constant 0 : i32
    %c0_i32_0 = arith.constant 0 : i32
    %c0_i32_1 = arith.constant 0 : i32
    %c0_i32_2 = arith.constant 0 : i32
    return %arg0, %c0_i32, %c0_i32_0, %c0_i32_1 : i32, i32, i32, i32
  }
  func.func @transform_1(%arg0: i32) -> (i32, i32, i32) {
    %c0_i32 = arith.constant 0 : i32
    %c0_i32_0 = arith.constant 0 : i32
    %c0_i32_1 = arith.constant 0 : i32
    %c0_i32_2 = arith.constant 0 : i32
    return %c0_i32, %c0_i32_0, %c0_i32_1 : i32, i32, i32
  }
  func.func @transform_2(%arg0: i32) -> (i32, i32) {
    %c0_i32 = arith.constant 0 : i32
    %c0_i32_0 = arith.constant 0 : i32
    %c0_i32_1 = arith.constant 0 : i32
    return %c0_i32, %c0_i32_0 : i32, i32
  }
  func.func @transform_3(%arg0: i32) -> (i32, i32) {
    %c0_i32 = arith.constant 0 : i32
    %c0_i32_0 = arith.constant 0 : i32
    %c0_i32_1 = arith.constant 0 : i32
    return %c0_i32, %c0_i32_0 : i32, i32
  }
  func.func @transform_4(%arg0: i32) -> (i32, i32, i32) {
    %c0_i32 = arith.constant 0 : i32
    %c0_i32_0 = arith.constant 0 : i32
    %c0_i32_1 = arith.constant 0 : i32
    return %arg0, %c0_i32, %c0_i32_0 : i32, i32, i32
  }
}

</mosaic_0001>

<bundles_post_ra>
// kernel: tpu_custom_call.1
= control target key start
LH: loop header
LB: loop body
LE: loop exit
PB: predicated region body
PF: predicated region fallthrough
CT: control target
= control target key end

     0   :  { %s2693_s15 = smov 0   ;;  %s4236_s0 = inlined_call_operand.vmem [shape: f32[2,16,16,4], index: 0, kind: input, shape index: {}]   ;;  %s4237_s1 = inlined_call_operand.vmem [shape: f32[9,4,8], index: 1, kind: input, shape index: {}]   ;;  %s4238_s2 = inlined_call_operand.vmem [shape: f32[1,8], index: 2, kind: input, shape index: {}]   ;;  %s4239_s3 = inlined_call_operand.vmem [shape: f32[1,8], index: 3, kind: input, shape index: {}]   ;;  %s4240_s4 = inlined_call_operand.vmem [shape: f32[2,256,8], index: 4, kind: output, shape index: {}]  }
   0x1 LB: > { %s2303_s16 = sadd.s32 4294967295, %s2665_s15   ;;  %p2307_p0 = scmp.ge.s32.totalorder %s2665_s15, 1  ;;  %s2665_s15 = sphi %s2693_s15, %s14_s15  }
   0x2   : > { %p162_p1 = scmp.lt.s32.totalorder %s2665_s15, 3 }
   0x4   : > { %p163_p2 = pnand %p2307_p0, %p162_p1 }
   0x6   : > { %166 = sbr.rel (%p163_p2) target bundleno = 783 (0x30f), region = 36 }
   0xb   : > { %v2312_v0 = vld [vmem:[%s4237_s1 + $0xc] sm:$0xf]  ;;  %vm472_vm0 = vcmask 1043456   ;;  %p188_p3 = scmp.lt.s32.totalorder %s2303_s16, 1  ;;  %vm230_vm1 = vcmask 31744   ;;  %v2667_v1 = vmov 0.0  }
   0xc   : > { %2621 = vmatpush.msk.msra.mxu1 %vm472_vm0, %v2312_v0  ;;  %2622 = vmatpush.msk.msra.mxu2 %vm472_vm0, %v2312_v0  ;;  %247 = vst.msk [vmem:[#allocation2 + $0x78] sm:$0xff] %vm230_vm1, %v2667_v1  ;;  %v2379_v4 = vld [vmem:[%s4237_s1 + $0x18] sm:$0xf]  ;;  %v2413_v5 = vld [vmem:[%s4237_s1 + $0x4] sm:$0xf]  ;;  %vm233_vm2 = vcmask 25600  }
   0xd   : > { %s4398_s16 = smov (!%p188_p3, %s2303_s16), 1  ;;  %248 = vst.msk [vmem:[#allocation2 + $0x80] sm:$0xff] %vm230_vm1, %v2667_v1  ;;  %2623 = vmatpush.msk.msra.mxu3 %vm472_vm0, %v2312_v0  ;;  %2313 = vmatpush.msk.msra.mxu0 %vm472_vm0, %v2312_v0  ;;  %v373_v6 = vld [vmem:[%s4237_s1] sm:$0xf]  ;;  %v2447_v9 = vld [vmem:[%s4237_s1 + $0x10] sm:$0xf] }
   0xe   : > { %231 = vst.msk [vmem:[#allocation2] sm:$0xff] %vm230_vm1, %v2667_v1  ;;  %s2619_s19 = sshll.u32 %s4398_s16, 8  ;;  %2380 = vmatpush.msk.msrb.mxu2 %vm472_vm0, %v2379_v4  ;;  %2346 = vmatpush.msk.msrb.mxu1 %vm472_vm0, %v373_v6  ;;  %v2515_v58 = vld [vmem:[%s4237_s1 + $0x8] sm:$0xf]  ;;  %v2549_v59 = vld [vmem:[%s4237_s1 + $0x14] sm:$0xf] }
   0xf   : > { %232 = vst.msk [vmem:[#allocation2 + $0x8] sm:$0xff] %vm230_vm1, %v2667_v1  ;;  %s2724_s22 = scalar_lea.vmem %s4236_s0, %s2619_s19  ;;  %2414 = vmatpush.msk.msrb.mxu3 %vm472_vm0, %v2413_v5  ;;  %2448 = vmatpush.msk.msrb.mxu0 %vm472_vm0, %v2447_v9  ;;  %v2481_v60 = vld [vmem:[%s4237_s1 + $0x1c] sm:$0xf]  ;;  %vm883_vm3 = vcmask 1046528   ;;  %vm1498_vm4 = vcmask 1045504   ;;  %vm2215_vm5 = vcmask 64512  }
  0x10   : > { %235 = vst.msk [vmem:[#allocation2 + $0x18] sm:$0xff] %vm230_vm1, %v2667_v1  ;;  %v206_v2 = vld [vmem:[%s2724_s22 + $0x40] sm:$0xff]  ;;  %v207_v10 = vld [vmem:[%s2724_s22 + $0x48] sm:$0xff]  ;;  %v208_v17 = vld [vmem:[%s2724_s22 + $0x50] sm:$0xff] }
  0x11   : > { %236 = vst.msk [vmem:[#allocation2 + $0x20] sm:$0xff] %vm230_vm1, %v2667_v1  ;;  %v214_v7 = vld [vmem:[%s2724_s22 + $0x80] sm:$0xff]  ;;  %v215_v14 = vld [vmem:[%s2724_s22 + $0x88] sm:$0xff]  ;;  %v216_v18 = vld [vmem:[%s2724_s22 + $0x90] sm:$0xff] }
  0x12   : > { %295 = vst.msk [vmem:[#allocation2 + $0x79] sm:$0xff] %vm230_vm1, %v206_v2  ;;  %v222_v8 = vld [vmem:[%s2724_s22 + $0xc0] sm:$0xff]  ;;  %v223_v16 = vld [vmem:[%s2724_s22 + $0xc8] sm:$0xff]  ;;  %v224_v20 = vld [vmem:[%s2724_s22 + $0xd0] sm:$0xff] }
  0x13   : > { %238 = vst.msk [vmem:[#allocation2 + $0x30] sm:$0xff] %vm230_vm1, %v2667_v1  ;;  %v198_v15 = vld [vmem:[%s2724_s22] sm:$0xff]  ;;  %v199_v19 = vld [vmem:[%s2724_s22 + $0x8] sm:$0xff]  ;;  %v209_v21 = vld [vmem:[%s2724_s22 + $0x58] sm:$0xff] }
  0x14   : > { %239 = vst.msk [vmem:[#allocation2 + $0x38] sm:$0xff] %vm230_vm1, %v2667_v1  ;;  %v217_v22 = vld [vmem:[%s2724_s22 + $0x98] sm:$0xff]  ;;  %v200_v23 = vld [vmem:[%s2724_s22 + $0x10] sm:$0xff]  ;;  %v210_v27 = vld [vmem:[%s2724_s22 + $0x60] sm:$0xff] }
  0x15   : > { %241 = vst.msk [vmem:[#allocation2 + $0x48] sm:$0xff] %vm230_vm1, %v2667_v1  ;;  %v225_v25 = vld [vmem:[%s2724_s22 + $0xd8] sm:$0xff]  ;;  %v218_v29 = vld [vmem:[%s2724_s22 + $0xa0] sm:$0xff]  ;;  %v211_v33 = vld [vmem:[%s2724_s22 + $0x68] sm:$0xff] }
  0x16   : > { %242 = vst.msk [vmem:[#allocation2 + $0x50] sm:$0xff] %vm230_vm1, %v2667_v1  ;;  %v201_v31 = vld [vmem:[%s2724_s22 + $0x18] sm:$0xff]  ;;  %v226_v32 = vld [vmem:[%s2724_s22 + $0xe0] sm:$0xff]  ;;  %v219_v35 = vld [vmem:[%s2724_s22 + $0xa8] sm:$0xff] }
  0x17   : > { %244 = vst.msk [vmem:[#allocation2 + $0x60] sm:$0xff] %vm230_vm1, %v2667_v1  ;;  %v202_v37 = vld [vmem:[%s2724_s22 + $0x20] sm:$0xff]  ;;  %v227_v39 = vld [vmem:[%s2724_s22 + $0xe8] sm:$0xff]  ;;  %v212_v41 = vld [vmem:[%s2724_s22 + $0x70] sm:$0xff] }
  0x18   : > { %245 = vst.msk [vmem:[#allocation2 + $0x68] sm:$0xff] %vm230_vm1, %v2667_v1  ;;  %v220_v42 = vld [vmem:[%s2724_s22 + $0xb0] sm:$0xff]  ;;  %v203_v43 = vld [vmem:[%s2724_s22 + $0x28] sm:$0xff]  ;;  %v213_v45 = vld [vmem:[%s2724_s22 + $0x78] sm:$0xff] }
  0x19   : > { %v2744_v3 = vld [vmem:[#allocation2 + $0x78] sm:$0xff]  ;;  %250 = vst.msk [vmem:[#allocation2 + $0x90] sm:$0xff] %vm230_vm1, %v2667_v1  ;;  %v228_v44 = vld [vmem:[%s2724_s22 + $0xf0] sm:$0xff] }
  0x1a   : > { %2322 = vmatmul.msk.f32.vlgmr.msra.gmra.mxu1 %vm230_vm1, %v2744_v3  ;;  %251 = vst.msk [vmem:[#allocation2 + $0x98] sm:$0xff] %vm230_vm1, %v2667_v1  ;;  %v221_v47 = vld [vmem:[%s2724_s22 + $0xb8] sm:$0xff]  ;;  %v204_v49 = vld [vmem:[%s2724_s22 + $0x30] sm:$0xff] }
  0x1b   : > { %253 = vst.msk [vmem:[#allocation2 + $0xa8] sm:$0xff] %vm230_vm1, %v2667_v1  ;;  %v229_v51 = vld [vmem:[%s2724_s22 + $0xf8] sm:$0xff]  ;;  %2482 = vmatpush.msk.msra.mxu1 %vm472_vm0, %v2481_v60 }
  0x1c   : > { %254 = vst.msk [vmem:[#allocation2 + $0xb0] sm:$0xff] %vm230_vm1, %v2667_v1  ;;  %v205_v53 = vld [vmem:[%s2724_s22 + $0x38] sm:$0xff]  ;;  %s3879_s22 = scalar_lea.vmem %s4240_s4, %s2619_s19 }
  0x1d   : > { %256 = vst.msk [vmem:[#allocation2 + $0xc0] sm:$0xff] %vm230_vm1, %v2667_v1 }
  0x1e   : > { %257 = vst.msk [vmem:[#allocation2 + $0xc8] sm:$0xff] %vm230_vm1, %v2667_v1 }
  0x1f   : > { %259 = vst.msk [vmem:[#allocation2 + $0xd8] sm:$0xff] %vm230_vm1, %v2667_v1 }
  0x20   : > { %260 = vst.msk [vmem:[#allocation2 + $0xe0] sm:$0xff] %vm230_vm1, %v2667_v1 }
  0x21   : > { %262 = vst.msk [vmem:[#allocation2 + $0xf0] sm:$0xff] %vm230_vm1, %v2667_v1 }
  0x22   : > { %263 = vst.msk [vmem:[#allocation2 + $0xf8] sm:$0xff] %vm230_vm1, %v2667_v1 }
  0x23   : > { %265 = vst.msk [vmem:[#allocation2 + $0x108] sm:$0xff] %vm230_vm1, %v2667_v1 }
  0x24   : > { %266 = vst.msk [vmem:[#allocation2 + $0x110] sm:$0xff] %vm230_vm1, %v2667_v1 }
  0x25   : > { %268 = vst.msk [vmem:[#allocation2 + $0x120] sm:$0xff] %vm230_vm1, %v2667_v1 }
  0x26   : > { %269 = vst.msk [vmem:[#allocation2 + $0x128] sm:$0xff] %vm230_vm1, %v2667_v1 }
  0x27   : > { %271 = vst.msk [vmem:[#allocation2 + $0x138] sm:$0xff] %vm230_vm1, %v2667_v1 }
  0x28   : > { %272 = vst.msk [vmem:[#allocation2 + $0x140] sm:$0xff] %vm230_vm1, %v2667_v1 }
  0x29   : > { %274 = vst.msk [vmem:[#allocation2 + $0x150] sm:$0xff] %vm230_vm1, %v2667_v1 }
  0x2a   : > { %275 = vst.msk [vmem:[#allocation2 + $0x158] sm:$0xff] %vm230_vm1, %v2667_v1 }
  0x2b   : > { %277 = vst.msk [vmem:[#allocation2 + $0x168] sm:$0xff] %vm230_vm1, %v2667_v1 }
  0x2c   : > { %278 = vst.msk [vmem:[#allocation2 + $0x170] sm:$0xff] %vm230_vm1, %v2667_v1 }
  0x2d   : > { %280 = vst.msk [vmem:[#allocation2 + $0x180] sm:$0xff] %vm230_vm1, %v2667_v1 }
  0x2e   : > { %281 = vst.msk [vmem:[#allocation2 + $0x188] sm:$0xff] %vm230_vm1, %v2667_v1 }
  0x2f   : > { %283 = vst.msk [vmem:[#allocation2 + $0x198] sm:$0xff] %vm230_vm1, %v2667_v1 }
  0x30   : > { %284 = vst.msk [vmem:[#allocation2 + $0x1a0] sm:$0xff] %vm230_vm1, %v2667_v1 }
  0x31   : > { %303 = vst.msk [vmem:[#allocation2 + $0xd9] sm:$0xff] %vm230_vm1, %v214_v7 }
  0x32   : > { %311 = vst.msk [vmem:[#allocation2 + $0x139] sm:$0xff] %vm230_vm1, %v222_v8 }
  0x33   : > { %249 = vst.msk [vmem:[#allocation2 + $0x88] sm:$0x3] %vm233_vm2, %v2667_v1 }
  0x34   : > { %296 = vst.msk [vmem:[#allocation2 + $0x81] sm:$0xff] %vm230_vm1, %v207_v10  ;;  %v3042_v10 = vld [vmem:[#allocation2] sm:$0xff] }
  0x35   : > { %234 = vst.msk [vmem:[#allocation2 + $0x10] sm:$0x3] %vm233_vm2, %v2667_v1 }
  0x36   : > { %237 = vst.msk [vmem:[#allocation2 + $0x28] sm:$0x3] %vm233_vm2, %v2667_v1 }
  0x37   : > { %240 = vst.msk [vmem:[#allocation2 + $0x40] sm:$0x3] %vm233_vm2, %v2667_v1 }
  0x38   : > { %v2826_v11 = vld [vmem:[#allocation2 + $0xd8] sm:$0xff]  ;;  %243 = vst.msk [vmem:[#allocation2 + $0x58] sm:$0x3] %vm233_vm2, %v2667_v1 }
  0x39   : > { %2330 = vmatmul.msk.f32.vlgmr.msra.gmra.mxu2 %vm230_vm1, %v2826_v11  ;;  %v2832_v12 = vld [vmem:[#allocation2 + $0x138] sm:$0xff]  ;;  %246 = vst.msk [vmem:[#allocation2 + $0x70] sm:$0x3] %vm233_vm2, %v2667_v1 }
  0x3a   : > { %2338 = vmatmul.msk.f32.vlgmr.msra.gmra.mxu3 %vm230_vm1, %v2832_v12  ;;  %252 = vst.msk [vmem:[#allocation2 + $0xa0] sm:$0x3] %vm233_vm2, %v2667_v1  ;;  %2516 = vmatpush.msk.msra.mxu2 %vm472_vm0, %v2515_v58 }
  0x3b   : > { %v2840_v13 = vld [vmem:[#allocation2 + $0x80] sm:$0xff]  ;;  %255 = vst.msk [vmem:[#allocation2 + $0xb8] sm:$0x3] %vm233_vm2, %v2667_v1  ;;  %2550 = vmatpush.msk.msra.mxu3 %vm472_vm0, %v2549_v59 }
  0x3c   : > { %2323 = vmatmul.msk.f32.gmra.mxu1 %vm230_vm1, %v2840_v13  ;;  %258 = vst.msk [vmem:[#allocation2 + $0xd0] sm:$0x3] %vm233_vm2, %v2667_v1 }
  0x3d   : > { %261 = vst.msk [vmem:[#allocation2 + $0xe8] sm:$0x3] %vm233_vm2, %v2667_v1 }
  0x3e   : > { %264 = vst.msk [vmem:[#allocation2 + $0x100] sm:$0x3] %vm233_vm2, %v2667_v1 }
  0x3f   : > { %267 = vst.msk [vmem:[#allocation2 + $0x118] sm:$0x3] %vm233_vm2, %v2667_v1 }
  0x40   : > { %270 = vst.msk [vmem:[#allocation2 + $0x130] sm:$0x3] %vm233_vm2, %v2667_v1 }
  0x41   : > { %273 = vst.msk [vmem:[#allocation2 + $0x148] sm:$0x3] %vm233_vm2, %v2667_v1 }
  0x42   : > { %276 = vst.msk [vmem:[#allocation2 + $0x160] sm:$0x3] %vm233_vm2, %v2667_v1 }
  0x43   : > { %279 = vst.msk [vmem:[#allocation2 + $0x178] sm:$0x3] %vm233_vm2, %v2667_v1 }
  0x44   : > { %282 = vst.msk [vmem:[#allocation2 + $0x190] sm:$0x3] %vm233_vm2, %v2667_v1 }
  0x45   : > { %285 = vst.msk [vmem:[#allocation2 + $0x1a8] sm:$0x3] %vm233_vm2, %v2667_v1  ;;  %v2583_v1 = vld [vmem:[%s4237_s1 + $0x20] sm:$0xf] }
  0x46   : > { %304 = vst.msk [vmem:[#allocation2 + $0xe1] sm:$0xff] %vm230_vm1, %v215_v14  ;;  %v3044_v14 = vld [vmem:[#allocation2 + $0x8] sm:$0xff] }
  0x47   : > { %287 = vst.msk [vmem:[#allocation2 + $0x19] sm:$0xff] %vm230_vm1, %v198_v15  ;;  %v884_v15 = vrot.slane %v3042_v10, 1 }
  0x48   : > { %312 = vst.msk [vmem:[#allocation2 + $0x141] sm:$0xff] %vm230_vm1, %v223_v16  ;;  %v885_v16 = vrot.slane %v3044_v14, 1 }
  0x49   : > { %297 = vst.msk [vmem:[#allocation2 + $0x91] sm:$0xff] %vm230_vm1, %v208_v17 }
  0x4a   : > { %305 = vst.msk [vmem:[#allocation2 + $0xf1] sm:$0xff] %vm230_vm1, %v216_v18  ;;  %v886_v18 = vsel %vm883_vm3, %v884_v15, %v885_v16 }
  0x4b   : > { %288 = vst.msk [vmem:[#allocation2 + $0x21] sm:$0xff] %vm230_vm1, %v199_v19  ;;  %v3059_v19 = vld [vmem:[#allocation2 + $0x10] sm:$0x3] }
  0x4c   : > { %313 = vst.msk [vmem:[#allocation2 + $0x151] sm:$0xff] %vm230_vm1, %v224_v20 }
  0x4d   : > { %v2883_v24 = vld [vmem:[#allocation2 + $0xe0] sm:$0xff]  ;;  %298 = vst.msk [vmem:[#allocation2 + $0x99] sm:$0xff] %vm230_vm1, %v209_v21 }
  0x4e   : > { %2331 = vmatmul.msk.f32.gmra.mxu2 %vm230_vm1, %v2883_v24  ;;  %v2889_v26 = vld [vmem:[#allocation2 + $0x18] sm:$0xff]  ;;  %306 = vst.msk [vmem:[#allocation2 + $0xf9] sm:$0xff] %vm230_vm1, %v217_v22  ;;  %v887_v22 = vrot.slane %v3059_v19, 1 }
  0x4f   : > { %2314 = vmatmul.msk.f32.vlgmr.msra.gmra.mxu0 %vm230_vm1, %v2889_v26  ;;  %v2895_v28 = vld [vmem:[#allocation2 + $0x140] sm:$0xff]  ;;  %289 = vst.msk [vmem:[#allocation2 + $0x31] sm:$0xff] %vm230_vm1, %v200_v23  ;;  %v889_v20 = vrot.slane %v2889_v26, 1 }
  0x50   : > { %2339 = vmatmul.msk.f32.gmra.mxu3 %vm230_vm1, %v2895_v28  ;;  %v2901_v30 = vld [vmem:[#allocation2 + $0x90] sm:$0xff]  ;;  %314 = vst.msk [vmem:[#allocation2 + $0x159] sm:$0xff] %vm230_vm1, %v225_v25  ;;  %2584 = vmatpush.msk.msra.mxu0 %vm472_vm0, %v2583_v1  ;;  %v888_v25 = vsel %vm883_vm3, %v885_v16, %v887_v22 }
  0x51   : > { %2324 = vmatmul.msk.f32.gmra.mxu1 %vm230_vm1, %v2901_v30  ;;  %299 = vst.msk [vmem:[#allocation2 + $0xa9] sm:$0xff] %vm230_vm1, %v210_v27  ;;  %v2911_v34 = vld [vmem:[#allocation2 + $0xf0] sm:$0xff] }
  0x52   : > { %307 = vst.msk [vmem:[#allocation2 + $0x109] sm:$0xff] %vm230_vm1, %v218_v29  ;;  %v2915_v36 = vld [vmem:[#allocation2 + $0x20] sm:$0xff]  ;;  %v3071_v27 = vld [vmem:[#allocation2 + $0x28] sm:$0x3] }
  0x53   : > { %290 = vst.msk [vmem:[#allocation2 + $0x39] sm:$0xff] %vm230_vm1, %v201_v31  ;;  %v2919_v38 = vld [vmem:[#allocation2 + $0x150] sm:$0xff]  ;;  %v890_v21 = vrot.slane %v2915_v36, 1  ;;  %v892_v29 = vrot.slane %v3071_v27, 1 }
  0x54   : > { %315 = vst.msk [vmem:[#allocation2 + $0x169] sm:$0xff] %vm230_vm1, %v226_v32  ;;  %v2925_v40 = vld [vmem:[#allocation2 + $0x98] sm:$0xff] }
  0x55   : > { %300 = vst.msk [vmem:[#allocation2 + $0xb1] sm:$0xff] %vm230_vm1, %v211_v33  ;;  %v2943_v46 = vld [vmem:[#allocation2 + $0xf8] sm:$0xff]  ;;  %v891_v23 = vsel %vm883_vm3, %v889_v20, %v890_v21  ;;  %v893_v31 = vsel %vm883_vm3, %v890_v21, %v892_v29  ;;  %v909_v20 = vrot.slane %v2744_v3, 1  ;;  %v910_v21 = vrot.slane %v2840_v13, 1  ;;  %v3182_v29 = vld [vmem:[#allocation2 + $0x88] sm:$0x3] }
  0x56   : > { %2332 = vmatmul.msk.f32.gmra.mxu2 %vm230_vm1, %v2911_v34  ;;  %308 = vst.msk [vmem:[#allocation2 + $0x111] sm:$0xff] %vm230_vm1, %v219_v35  ;;  %v2947_v48 = vld [vmem:[#allocation2 + $0x30] sm:$0xff] }
  0x57   : > { %2315 = vmatmul.msk.f32.gmra.mxu0 %vm230_vm1, %v2915_v36  ;;  %291 = vst.msk [vmem:[#allocation2 + $0x49] sm:$0xff] %vm230_vm1, %v202_v37  ;;  %v2951_v50 = vld [vmem:[#allocation2 + $0x158] sm:$0xff]  ;;  %v894_v32 = vrot.slane %v2947_v48, 1 }
  0x58   : > { %2340 = vmatmul.msk.f32.gmra.mxu3 %vm230_vm1, %v2919_v38  ;;  %316 = vst.msk [vmem:[#allocation2 + $0x171] sm:$0xff] %vm230_vm1, %v227_v39  ;;  %v2957_v52 = vld [vmem:[#allocation2 + $0xa8] sm:$0xff] }
  0x59   : > { %2325 = vmatmul.msk.f32.gmra.mxu1 %vm230_vm1, %v2925_v40  ;;  %301 = vst.msk [vmem:[#allocation2 + $0xc1] sm:$0xff] %vm230_vm1, %v212_v41  ;;  %v2970_v54 = vld [vmem:[#allocation2 + $0x108] sm:$0xff] }
  0x5a   : > { %309 = vst.msk [vmem:[#allocation2 + $0x121] sm:$0xff] %vm230_vm1, %v220_v42  ;;  %v2972_v55 = vld [vmem:[#allocation2 + $0x38] sm:$0xff]  ;;  %v3092_v37 = vld [vmem:[#allocation2 + $0x40] sm:$0x3] }
  0x5b   : > { %292 = vst.msk [vmem:[#allocation2 + $0x51] sm:$0xff] %vm230_vm1, %v203_v43  ;;  %v2974_v56 = vld [vmem:[#allocation2 + $0x168] sm:$0xff]  ;;  %v895_v33 = vrot.slane %v2972_v55, 1  ;;  %v897_v39 = vrot.slane %v3092_v37, 1 }
  0x5c   : > { %317 = vst.msk [vmem:[#allocation2 + $0x181] sm:$0xff] %vm230_vm1, %v228_v44  ;;  %v2978_v57 = vld [vmem:[#allocation2 + $0xb0] sm:$0xff] }
  0x5d   : > { %302 = vst.msk [vmem:[#allocation2 + $0xc9] sm:$0xff] %vm230_vm1, %v213_v45  ;;  %v2998_v61 = vld [vmem:[#allocation2 + $0x110] sm:$0xff]  ;;  %v3090_v35 = vsel %vm883_vm3, %v894_v32, %v895_v33  ;;  %v3103_v41 = vsel %vm883_vm3, %v895_v33, %v897_v39  ;;  %v912_v32 = vrot.slane %v3182_v29, 1 }
  0x5e   : > { %2333 = vmatmul.msk.f32.gmra.mxu2 %vm230_vm1, %v2943_v46  ;;  %310 = vst.msk [vmem:[#allocation2 + $0x129] sm:$0xff] %vm230_vm1, %v221_v47  ;;  %v3000_v62 = vld [vmem:[#allocation2 + $0x48] sm:$0xff] }
  0x5f   : > { %2316 = vmatmul.msk.f32.gmra.mxu0 %vm230_vm1, %v2947_v48  ;;  %293 = vst.msk [vmem:[#allocation2 + $0x61] sm:$0xff] %vm230_vm1, %v204_v49  ;;  %v3002_v63 = vld [vmem:[#allocation2 + $0x170] sm:$0xff]  ;;  %v899_v42 = vrot.slane %v3000_v62, 1 }
  0x60   : > { %2341 = vmatmul.msk.f32.gmra.mxu3 %vm230_vm1, %v2951_v50  ;;  %318 = vst.msk [vmem:[#allocation2 + $0x189] sm:$0xff] %vm230_vm1, %v229_v51  ;;  %v3006_v0 = vld [vmem:[#allocation2 + $0xc0] sm:$0xff] }
  0x61   : > { %2326 = vmatmul.msk.f32.gmra.mxu1 %vm230_vm1, %v2957_v52  ;;  %294 = vst.msk [vmem:[#allocation2 + $0x69] sm:$0xff] %vm230_vm1, %v205_v53  ;;  %v3018_v2 = vld [vmem:[#allocation2 + $0x120] sm:$0xff] }
  0x62   : > { %v3020_v4 = vld [vmem:[#allocation2 + $0x50] sm:$0xff]  ;;  %v3118_v45 = vld [vmem:[#allocation2 + $0x58] sm:$0x3]  ;;  %4266 = vst [vmem:[#allocation11_spill] sm:$0xff] %v3182_v29 }
  0x63   : > { %v3022_v5 = vld [vmem:[#allocation2 + $0x180] sm:$0xff]  ;;  %v900_v43 = vrot.slane %v3020_v4, 1  ;;  %4260 = vst [vmem:[#allocation5_spill] sm:$0xff] %v3118_v45  ;;  %v902_v47 = vrot.slane %v3118_v45, 1 }
  0x64   : > { %v3026_v6 = vld [vmem:[#allocation2 + $0xc8] sm:$0xff] }
  0x65   : > { %v3034_v7 = vld [vmem:[#allocation2 + $0x128] sm:$0xff]  ;;  %v3116_v44 = vsel %vm883_vm3, %v899_v42, %v900_v43  ;;  %v3130_v49 = vsel %vm883_vm3, %v900_v43, %v902_v47  ;;  %v3202_v43 = vsel %vm883_vm3, %v910_v21, %v912_v32  ;;  %v3225_v32 = vld [vmem:[#allocation2 + $0xa0] sm:$0x3] }
  0x66   : > { %2334 = vmatmul.msk.f32.gmra.mxu2 %vm230_vm1, %v2970_v54  ;;  %v3036_v8 = vld [vmem:[#allocation2 + $0x60] sm:$0xff]  ;;  %4268 = vst [vmem:[#allocation13_spill] sm:$0xff] %v3202_v43 }
  0x67   : > { %2317 = vmatmul.msk.f32.gmra.mxu0 %vm230_vm1, %v2972_v55  ;;  %4258 = vst [vmem:[#allocation3_spill] sm:$0xff] %v3036_v8  ;;  %v3038_v9 = vld [vmem:[#allocation2 + $0x188] sm:$0xff]  ;;  %v904_v51 = vrot.slane %v3036_v8, 1 }
  0x68   : > { %2342 = vmatmul.msk.f32.gmra.mxu3 %vm230_vm1, %v2974_v56  ;;  %v3054_v17 = vld [vmem:[#allocation2 + $0x68] sm:$0xff]  ;;  %v3147_v60 = vld [vmem:[#allocation2 + $0x70] sm:$0x3]  ;;  %4271 = vst [vmem:[#allocation16_spill] sm:$0xff] %v3225_v32 }
  0x69   : > { %2327 = vmatmul.msk.f32.gmra.mxu1 %vm230_vm1, %v2978_v57  ;;  %4259 = vst [vmem:[#allocation4_spill] sm:$0xff] %v3054_v17  ;;  %v905_v53 = vrot.slane %v3054_v17, 1  ;;  %v907_v1 = vrot.slane %v3147_v60, 1 }
  0x6a   : > { %4262 = vst [vmem:[#allocation7_spill] sm:$0xff] %v3147_v60  ;;  %v3268_v60 = vld [vmem:[#allocation2 + $0xb8] sm:$0x3] }
  0x6b   : > { %v3145_v59 = vsel %vm883_vm3, %v904_v51, %v905_v53  ;;  %v3159_v15 = vsel %vm883_vm3, %v905_v53, %v907_v1  ;;  %v915_v51 = vrot.slane %v2925_v40, 1  ;;  %4278 = vst [vmem:[#allocation23_spill] sm:$0xff] %v3268_v60 }
  0x6c   : > { %4261 = vst [vmem:[#allocation6_spill] sm:$0xff] %v3145_v59 }
  0x6d   : > { %4263 = vst [vmem:[#allocation8_spill] sm:$0xff] %v3159_v15 }
  0x6e   : > { %2335 = vmatmul.msk.f32.gmra.mxu2 %vm230_vm1, %v2998_v61 }
  0x6f   : > { %2318 = vmatmul.msk.f32.gmra.mxu0 %vm230_vm1, %v3000_v62 }
  0x70   : > { %2343 = vmatmul.msk.f32.gmra.mxu3 %vm230_vm1, %v3002_v63 }
  0x71   : > { %2328 = vmatmul.msk.f32.gmra.mxu1 %vm230_vm1, %v3006_v0 }
  0x76   : > { %2336 = vmatmul.msk.f32.gmra.mxu2 %vm230_vm1, %v3018_v2 }
  0x77   : > { %2319 = vmatmul.msk.f32.gmra.mxu0 %vm230_vm1, %v3020_v4 }
  0x78   : > { %2344 = vmatmul.msk.f32.gmra.mxu3 %vm230_vm1, %v3022_v5 }
  0x79   : > { %2329 = vmatmul.msk.f32.gmra.mxu1 %vm230_vm1, %v3026_v6 }
  0x7e   : > { %2337 = vmatmul.msk.f32.gmra.mxu2 %vm230_vm1, %v3034_v7 }
  0x7f   : > { %2320 = vmatmul.msk.f32.gmra.mxu0 %vm230_vm1, %v3036_v8 }
  0x80   : > { %2345 = vmatmul.msk.f32.gmra.mxu3 %vm230_vm1, %v3038_v9 }
  0x81   : > { %2347 = vmatmul.msk.f32.vlgmr.msrb.gmra.mxu1 %vm230_vm1, %v3042_v10 }
  0x86   : > { %2381 = vmatmul.msk.f32.vlgmr.msrb.gmra.mxu2 %vm230_vm1, %v2947_v48 }
  0x87   : > { %2321 = vmatmul.msk.f32.gmra.mxu0 %vm230_vm1, %v3054_v17 }
  0x88   : > { %2415 = vmatmul.msk.f32.vlgmr.msrb.gmra.mxu3 %vm230_vm1, %v886_v18 }
  0x89   : > { %2348 = vmatmul.msk.f32.gmra.mxu1 %vm230_vm1, %v3044_v14 }
  0x8e   : > { %2382 = vmatmul.msk.f32.gmra.mxu2 %vm230_vm1, %v2972_v55 }
  0x8f   : > { %2449 = vmatmul.msk.f32.vlgmr.msrb.gmra.mxu0 %vm230_vm1, %v891_v23 }
  0x90   : > { %2416 = vmatmul.msk.f32.gmra.mxu3 %vm230_vm1, %v888_v25  ;;  %v3180_v25 = vsel %vm883_vm3, %v909_v20, %v910_v21 }
  0x91   : > { %2349 = vmatmul.msk.f32.gmra.mxu1 %vm230_vm1, %v2889_v26  ;;  %4265 = vst [vmem:[#allocation10_spill] sm:$0xff] %v3180_v25 }
  0x96   : > { %2383 = vmatmul.msk.f32.gmra.mxu2 %vm230_vm1, %v3000_v62 }
  0x97   : > { %2450 = vmatmul.msk.f32.gmra.mxu0 %vm230_vm1, %v893_v31  ;;  %v3142_v58 = vpop.f32.mrf.mxu1 }
  0x98   : > { %2417 = vmatmul.msk.f32.gmra.mxu3 %vm230_vm1, %v891_v23 }
  0x99   : > { %2350 = vmatmul.msk.f32.gmra.mxu1 %vm230_vm1, %v2915_v36 }
  0x9e   : > { %2384 = vmatmul.msk.f32.gmra.mxu2 %vm230_vm1, %v3020_v4 }
  0x9f   : > { %2451 = vmatmul.msk.f32.gmra.mxu0 %vm230_vm1, %v3090_v35 }
  0xa0   : > { %2418 = vmatmul.msk.f32.gmra.mxu3 %vm230_vm1, %v893_v31 }
  0xa1   : > { %2351 = vmatmul.msk.f32.gmra.mxu1 %vm230_vm1, %v2947_v48 }
  0xa6   : > { %2385 = vmatmul.msk.f32.gmra.mxu2 %vm230_vm1, %v3036_v8 }
  0xa7   : > { %2452 = vmatmul.msk.f32.gmra.mxu0 %vm230_vm1, %v3103_v41 }
  0xa8   : > { %2419 = vmatmul.msk.f32.gmra.mxu3 %vm230_vm1, %v3090_v35 }
  0xa9   : > { %2352 = vmatmul.msk.f32.gmra.mxu1 %vm230_vm1, %v2972_v55 }
  0xae   : > { %2386 = vmatmul.msk.f32.gmra.mxu2 %vm230_vm1, %v3054_v17 }
  0xaf   : > { %2453 = vmatmul.msk.f32.gmra.mxu0 %vm230_vm1, %v3116_v44 }
  0xb0   : > { %2420 = vmatmul.msk.f32.gmra.mxu3 %vm230_vm1, %v3103_v41 }
  0xb1   : > { %2353 = vmatmul.msk.f32.gmra.mxu1 %vm230_vm1, %v3000_v62 }
  0xb6   : > { %2387 = vmatmul.msk.f32.gmra.mxu2 %vm230_vm1, %v2744_v3 }
  0xb7   : > { %2454 = vmatmul.msk.f32.gmra.mxu0 %vm230_vm1, %v3130_v49 }
  0xb8   : > { %2421 = vmatmul.msk.f32.gmra.mxu3 %vm230_vm1, %v3116_v44 }
  0xb9   : > { %2354 = vmatmul.msk.f32.gmra.mxu1 %vm230_vm1, %v3020_v4  ;;  %v3161_v16 = vpop.f32.mrf.mxu1 }
  0xbc   : > { %v3167_v18 = vpop.f32.mrf.mxu2 }
  0xbd   : > { %v3173_v22 = vpop.f32.mrf.mxu3 }
  0xbe   : > { %2388 = vmatmul.msk.f32.gmra.mxu2 %vm230_vm1, %v2840_v13  ;;  %4264 = vst [vmem:[#allocation9_spill] sm:$0xff] %v3173_v22 }
  0xbf   : > { %2455 = vmatmul.msk.f32.gmra.mxu0 %vm230_vm1, %v3145_v59 }
  0xc0   : > { %2422 = vmatmul.msk.f32.gmra.mxu3 %vm230_vm1, %v3130_v49 }
  0xc1   : > { %2355 = vmatmul.msk.f32.gmra.mxu1 %vm230_vm1, %v3036_v8 }
  0xc6   : > { %2389 = vmatmul.msk.f32.gmra.mxu2 %vm230_vm1, %v2901_v30 }
  0xc7   : > { %2456 = vmatmul.msk.f32.gmra.mxu0 %vm230_vm1, %v3159_v15 }
  0xc8   : > { %2423 = vmatmul.msk.f32.gmra.mxu3 %vm230_vm1, %v3145_v59 }
  0xc9   : > { %2356 = vmatmul.msk.f32.gmra.mxu1 %vm230_vm1, %v3054_v17 }
  0xcc   : > { %v3177_v23 = vpop.f32.mrf.mxu0 }
  0xce   : > { %2390 = vmatmul.msk.f32.gmra.mxu2 %vm230_vm1, %v2925_v40  ;;  %v3186_v31 = vpop.f32.mrf.mxu1 }
  0xcf   : > { %2457 = vmatmul.msk.f32.gmra.mxu0 %vm230_vm1, %v3180_v25 }
  0xd0   : > { %2424 = vmatmul.msk.f32.gmra.mxu3 %vm230_vm1, %v3159_v15 }
  0xd1   : > { %v3193_v33 = vpop.f32.mrf.mxu2  ;;  %2357 = vmatmul.msk.f32.gmra.mxu1 %vm230_vm1, %v2744_v3  ;;  %v914_v3 = vrot.slane %v2901_v30, 1 }
  0xd3   : > { %v3197_v39 = vpop.f32.mrf.mxu3  ;;  %v3223_v21 = vsel %vm883_vm3, %v914_v3, %v915_v51 }
  0xd4   : > { %4267 = vst [vmem:[#allocation12_spill] sm:$0xff] %v3197_v39  ;;  %v3199_v42 = vpop.f32.mrf.mxu0 }
  0xd5   : > { %4270 = vst [vmem:[#allocation15_spill] sm:$0xff] %v3223_v21 }
  0xd6   : > { %2391 = vmatmul.msk.f32.gmra.mxu2 %vm230_vm1, %v2957_v52  ;;  %v3206_v47 = vpop.f32.mrf.mxu1 }
  0xd7   : > { %2458 = vmatmul.msk.f32.gmra.mxu0 %vm230_vm1, %v3202_v43 }
  0xd8   : > { %2425 = vmatmul.msk.f32.gmra.mxu3 %vm230_vm1, %v3180_v25 }
  0xd9   : > { %v3214_v53 = vpop.f32.mrf.mxu2  ;;  %2358 = vmatmul.msk.f32.gmra.mxu1 %vm230_vm1, %v2840_v13  ;;  %v917_v13 = vrot.slane %v3225_v32, 1 }
  0xdb   : > { %v3218_v1 = vpop.f32.mrf.mxu3  ;;  %v3245_v29 = vsel %vm883_vm3, %v915_v51, %v917_v13 }
  0xdc   : > { %4269 = vst [vmem:[#allocation14_spill] sm:$0xff] %v3218_v1  ;;  %v3220_v20 = vpop.f32.mrf.mxu0 }
  0xdd   : > { %4274 = vst [vmem:[#allocation19_spill] sm:$0xff] %v3245_v29 }
  0xde   : > { %2392 = vmatmul.msk.f32.gmra.mxu2 %vm230_vm1, %v2978_v57  ;;  %v3229_v39 = vpop.f32.mrf.mxu1 }
  0xdf   : > { %2459 = vmatmul.msk.f32.gmra.mxu0 %vm230_vm1, %v3223_v21 }
  0xe0   : > { %2426 = vmatmul.msk.f32.gmra.mxu3 %vm230_vm1, %v3202_v43 }
  0xe1   : > { %v3236_v1 = vpop.f32.mrf.mxu2  ;;  %2359 = vmatmul.msk.f32.gmra.mxu1 %vm230_vm1, %v2901_v30  ;;  %v919_v30 = vrot.slane %v2957_v52, 1 }
  0xe2   : > { %4272 = vst [vmem:[#allocation17_spill] sm:$0xff] %v3236_v1 }
  0xe3   : > { %v3240_v3 = vpop.f32.mrf.mxu3 }
  0xe4   : > { %4273 = vst [vmem:[#allocation18_spill] sm:$0xff] %v3240_v3  ;;  %v3242_v22 = vpop.f32.mrf.mxu0  ;;  %v920_v3 = vrot.slane %v2978_v57, 1 }
  0xe6   : > { %2393 = vmatmul.msk.f32.gmra.mxu2 %vm230_vm1, %v3006_v0  ;;  %v3249_v25 = vpop.f32.mrf.mxu1  ;;  %v3266_v43 = vsel %vm883_vm3, %v919_v30, %v920_v3 }
  0xe7   : > { %2460 = vmatmul.msk.f32.gmra.mxu0 %vm230_vm1, %v3245_v29  ;;  %4277 = vst [vmem:[#allocation22_spill] sm:$0xff] %v3266_v43 }
  0xe8   : > { %2427 = vmatmul.msk.f32.gmra.mxu3 %vm230_vm1, %v3223_v21 }
  0xe9   : > { %v3257_v32 = vpop.f32.mrf.mxu2  ;;  %2360 = vmatmul.msk.f32.gmra.mxu1 %vm230_vm1, %v2925_v40  ;;  %v922_v40 = vrot.slane %v3268_v60, 1 }
  0xea   : > { %4275 = vst [vmem:[#allocation20_spill] sm:$0xff] %v3257_v32 }
  0xeb   : > { %v3261_v51 = vpop.f32.mrf.mxu3  ;;  %v3288_v17 = vsel %vm883_vm3, %v920_v3, %v922_v40 }
  0xec   : > { %4276 = vst [vmem:[#allocation21_spill] sm:$0xff] %v3261_v51  ;;  %v3263_v13 = vpop.f32.mrf.mxu0 }
  0xed   : > { %4281 = vst [vmem:[#allocation26_spill] sm:$0xff] %v3288_v17 }
  0xee   : > { %2394 = vmatmul.msk.f32.gmra.mxu2 %vm230_vm1, %v3026_v6  ;;  %v3272_v21 = vpop.f32.mrf.mxu1 }
  0xef   : > { %2461 = vmatmul.msk.f32.gmra.mxu0 %vm230_vm1, %v3266_v43 }
  0xf0   : > { %2428 = vmatmul.msk.f32.gmra.mxu3 %vm230_vm1, %v3245_v29 }
  0xf1   : > { %v3279_v51 = vpop.f32.mrf.mxu2  ;;  %2361 = vmatmul.msk.f32.gmra.mxu1 %vm230_vm1, %v2957_v52  ;;  %v924_v52 = vrot.slane %v3006_v0, 1 }
  0xf2   : > { %4279 = vst [vmem:[#allocation24_spill] sm:$0xff] %v3279_v51  ;;  %v3311_v51 = vld [vmem:[#allocation2 + $0xd0] sm:$0x3] }
  0xf3   : > { %v3283_v30 = vpop.f32.mrf.mxu3  ;;  %4284 = vst [vmem:[#allocation29_spill] sm:$0xff] %v3311_v51 }
  0xf4   : > { %4280 = vst [vmem:[#allocation25_spill] sm:$0xff] %v3283_v30  ;;  %v3285_v15 = vpop.f32.mrf.mxu0  ;;  %v925_v30 = vrot.slane %v3026_v6, 1 }
  0xf6   : > { %2395 = vmatmul.msk.f32.gmra.mxu2 %vm230_vm1, %v2826_v11  ;;  %v3292_v8 = vpop.f32.mrf.mxu1  ;;  %v3309_v29 = vsel %vm883_vm3, %v924_v52, %v925_v30 }
  0xf7   : > { %2462 = vmatmul.msk.f32.gmra.mxu0 %vm230_vm1, %v3288_v17 }
  0xf8   : > { %2429 = vmatmul.msk.f32.gmra.mxu3 %vm230_vm1, %v3266_v43 }
  0xf9   : > { %v3300_v60 = vpop.f32.mrf.mxu2  ;;  %2362 = vmatmul.msk.f32.gmra.mxu1 %vm230_vm1, %v2978_v57  ;;  %v927_v57 = vrot.slane %v3311_v51, 1 }
  0xfa   : > { %4282 = vst [vmem:[#allocation27_spill] sm:$0xff] %v3300_v60 }
  0xfb   : > { %v3304_v3 = vpop.f32.mrf.mxu3  ;;  %v3329_v32 = vsel %vm883_vm3, %v925_v30, %v927_v57 }
  0xfc   : > { %4283 = vst [vmem:[#allocation28_spill] sm:$0xff] %v3304_v3  ;;  %v3306_v40 = vpop.f32.mrf.mxu0 }
  0xfe   : > { %2396 = vmatmul.msk.f32.gmra.mxu2 %vm230_vm1, %v2883_v24  ;;  %v615_v43 = vpop.f32.mrf.mxu1 }
  0xff   : > { %2463 = vmatmul.msk.f32.gmra.mxu0 %vm230_vm1, %v3309_v29  ;;  %v616_v51 = vadd.f32 %v615_v43, %v3177_v23  ;;  %v3349_v23 = vld [vmem:[#allocation2 + $0xe8] sm:$0x3] }
 0x100   : > { %2430 = vmatmul.msk.f32.gmra.mxu3 %vm230_vm1, %v3288_v17 }
 0x101   : > { %v3320_v3 = vpop.f32.mrf.mxu2  ;;  %2363 = vmatmul.msk.f32.gmra.mxu1 %vm230_vm1, %v3006_v0  ;;  %v929_v0 = vrot.slane %v2826_v11, 1 }
 0x102   : > { %4285 = vst [vmem:[#allocation30_spill] sm:$0xff] %v3320_v3 }
 0x103   : > { %v3324_v52 = vpop.f32.mrf.mxu3 }
 0x104   : > { %4286 = vst [vmem:[#allocation31_spill] sm:$0xff] %v3324_v52  ;;  %v3326_v60 = vpop.f32.mrf.mxu0  ;;  %v930_v52 = vrot.slane %v2883_v24, 1 }
 0x106   : > { %2397 = vmatmul.msk.f32.gmra.mxu2 %vm230_vm1, %v2911_v34  ;;  %v618_v59 = vpop.f32.mrf.mxu1  ;;  %v3347_v1 = vsel %vm883_vm3, %v929_v0, %v930_v52 }
 0x107   : > { %2464 = vmatmul.msk.f32.gmra.mxu0 %vm230_vm1, %v3329_v32 }
 0x108   : > { %2431 = vmatmul.msk.f32.gmra.mxu3 %vm230_vm1, %v3309_v29 }
 0x109   : > { %v739_v17 = vpop.f32.mrf.mxu2  ;;  %2364 = vmatmul.msk.f32.gmra.mxu1 %vm230_vm1, %v3026_v6  ;;  %v619_v6 = vadd.f32 %v618_v59, %v3199_v42 }
 0x10a   : > { %v835_v30 = vadd.f32 %v739_v17, %v616_v51  ;;  %v932_v17 = vrot.slane %v3349_v23, 1 }
 0x10b   : > { %v1050_v57 = vpop.f32.mrf.mxu3 }
 0x10c   : > { %v3342_v3 = vadd.f32 %v1050_v57, %v835_v30  ;;  %v3344_v45 = vpop.f32.mrf.mxu0 }
 0x10d   : > { %4288 = vst [vmem:[#allocation33_spill] sm:$0xff] %v3344_v45 }
 0x10e   : > { %4287 = vst [vmem:[#allocation32_spill] sm:$0xff] %v3342_v3  ;;  %2398 = vmatmul.msk.f32.gmra.mxu2 %vm230_vm1, %v2943_v46  ;;  %v621_v43 = vpop.f32.mrf.mxu1  ;;  %v3366_v3 = vsel %vm883_vm3, %v930_v52, %v932_v17 }
 0x10f   : > { %2465 = vmatmul.msk.f32.gmra.mxu0 %vm230_vm1, %v3347_v1  ;;  %v622_v42 = vadd.f32 %v621_v43, %v3220_v20  ;;  %v3386_v20 = vld [vmem:[#allocation2 + $0x100] sm:$0x3] }
 0x110   : > { %2432 = vmatmul.msk.f32.gmra.mxu3 %vm230_vm1, %v3329_v32 }
 0x111   : > { %v742_v51 = vpop.f32.mrf.mxu2  ;;  %2365 = vmatmul.msk.f32.gmra.mxu1 %vm230_vm1, %v2826_v11  ;;  %v934_v11 = vrot.slane %v2911_v34, 1 }
 0x112   : > { %v836_v0 = vadd.f32 %v742_v51, %v619_v6  ;;  %v935_v6 = vrot.slane %v2943_v46, 1 }
 0x113   : > { %v1053_v30 = vpop.f32.mrf.mxu3 }
 0x114   : > { %v3361_v57 = vadd.f32 %v1053_v30, %v836_v0  ;;  %v3363_v45 = vpop.f32.mrf.mxu0 }
 0x115   : > { %4289 = vst [vmem:[#allocation34_spill] sm:$0xff] %v3363_v45  ;;  %v3384_v45 = vsel %vm883_vm3, %v934_v11, %v935_v6 }
 0x116   : > { %2399 = vmatmul.msk.f32.gmra.mxu2 %vm230_vm1, %v2970_v54  ;;  %v624_v59 = vpop.f32.mrf.mxu1 }
 0x117   : > { %2466 = vmatmul.msk.f32.gmra.mxu0 %vm230_vm1, %v3366_v3 }
 0x118   : > { %2433 = vmatmul.msk.f32.gmra.mxu3 %vm230_vm1, %v3347_v1 }
 0x119   : > { %v745_v51 = vpop.f32.mrf.mxu2  ;;  %2366 = vmatmul.msk.f32.gmra.mxu1 %vm230_vm1, %v2883_v24  ;;  %v625_v24 = vadd.f32 %v624_v59, %v3242_v22 }
 0x11a   : > { %v837_v52 = vadd.f32 %v745_v51, %v622_v42  ;;  %v937_v42 = vrot.slane %v3386_v20, 1 }
 0x11b   : > { %v1056_v17 = vpop.f32.mrf.mxu3 }
 0x11c   : > { %v3379_v0 = vadd.f32 %v1056_v17, %v837_v52  ;;  %v3381_v30 = vpop.f32.mrf.mxu0 }
 0x11d   : > { %4291 = vst [vmem:[#allocation36_spill] sm:$0xff] %v3381_v30 }
 0x11e   : > { %4290 = vst [vmem:[#allocation35_spill] sm:$0xff] %v3379_v0  ;;  %2400 = vmatmul.msk.f32.gmra.mxu2 %vm230_vm1, %v2998_v61  ;;  %v627_v43 = vpop.f32.mrf.mxu1  ;;  %v3403_v0 = vsel %vm883_vm3, %v935_v6, %v937_v42 }
 0x11f   : > { %2467 = vmatmul.msk.f32.gmra.mxu0 %vm230_vm1, %v3384_v45  ;;  %v628_v59 = vadd.f32 %v627_v43, %v3263_v13  ;;  %v3423_v13 = vld [vmem:[#allocation2 + $0x118] sm:$0x3] }
 0x120   : > { %2434 = vmatmul.msk.f32.gmra.mxu3 %vm230_vm1, %v3366_v3 }
 0x121   : > { %v748_v51 = vpop.f32.mrf.mxu2  ;;  %2367 = vmatmul.msk.f32.gmra.mxu1 %vm230_vm1, %v2911_v34  ;;  %v939_v34 = vrot.slane %v2970_v54, 1 }
 0x122   : > { %v838_v11 = vadd.f32 %v748_v51, %v625_v24  ;;  %v940_v24 = vrot.slane %v2998_v61, 1 }
 0x123   : > { %v1059_v52 = vpop.f32.mrf.mxu3 }
 0x124   : > { %v3398_v17 = vadd.f32 %v1059_v52, %v838_v11  ;;  %v3400_v30 = vpop.f32.mrf.mxu0 }
 0x125   : > { %4292 = vst [vmem:[#allocation37_spill] sm:$0xff] %v3400_v30  ;;  %v3421_v30 = vsel %vm883_vm3, %v939_v34, %v940_v24 }
 0x126   : > { %2401 = vmatmul.msk.f32.gmra.mxu2 %vm230_vm1, %v3018_v2  ;;  %v630_v22 = vpop.f32.mrf.mxu1 }
 0x127   : > { %2468 = vmatmul.msk.f32.gmra.mxu0 %vm230_vm1, %v3403_v0 }
 0x128   : > { %2435 = vmatmul.msk.f32.gmra.mxu3 %vm230_vm1, %v3384_v45 }
 0x129   : > { %v751_v51 = vpop.f32.mrf.mxu2  ;;  %2368 = vmatmul.msk.f32.gmra.mxu1 %vm230_vm1, %v2943_v46  ;;  %v631_v46 = vadd.f32 %v630_v22, %v3285_v15 }
 0x12a   : > { %v839_v6 = vadd.f32 %v751_v51, %v628_v59  ;;  %v942_v59 = vrot.slane %v3423_v13, 1 }
 0x12b   : > { %v1062_v42 = vpop.f32.mrf.mxu3 }
 0x12c   : > { %v3416_v11 = vadd.f32 %v1062_v42, %v839_v6  ;;  %v3418_v52 = vpop.f32.mrf.mxu0 }
 0x12d   : > { %4294 = vst [vmem:[#allocation39_spill] sm:$0xff] %v3418_v52 }
 0x12e   : > { %4293 = vst [vmem:[#allocation38_spill] sm:$0xff] %v3416_v11  ;;  %2402 = vmatmul.msk.f32.gmra.mxu2 %vm230_vm1, %v3034_v7  ;;  %v633_v43 = vpop.f32.mrf.mxu1  ;;  %v3440_v11 = vsel %vm883_vm3, %v940_v24, %v942_v59 }
 0x12f   : > { %2469 = vmatmul.msk.f32.gmra.mxu0 %vm230_vm1, %v3421_v30  ;;  %v634_v22 = vadd.f32 %v633_v43, %v3306_v40  ;;  %v3460_v40 = vld [vmem:[#allocation2 + $0x130] sm:$0x3] }
 0x130   : > { %2436 = vmatmul.msk.f32.gmra.mxu3 %vm230_vm1, %v3403_v0 }
 0x131   : > { %v754_v51 = vpop.f32.mrf.mxu2  ;;  %2369 = vmatmul.msk.f32.gmra.mxu1 %vm230_vm1, %v2970_v54  ;;  %v944_v54 = vrot.slane %v3018_v2, 1 }
 0x132   : > { %v840_v34 = vadd.f32 %v754_v51, %v631_v46  ;;  %v945_v46 = vrot.slane %v3034_v7, 1 }
 0x133   : > { %v1065_v6 = vpop.f32.mrf.mxu3 }
 0x134   : > { %v3435_v42 = vadd.f32 %v1065_v6, %v840_v34  ;;  %v3437_v52 = vpop.f32.mrf.mxu0 }
 0x135   : > { %4295 = vst [vmem:[#allocation40_spill] sm:$0xff] %v3437_v52  ;;  %v3458_v52 = vsel %vm883_vm3, %v944_v54, %v945_v46 }
 0x136   : > { %2403 = vmatmul.msk.f32.gmra.mxu2 %vm230_vm1, %v2832_v12  ;;  %v636_v15 = vpop.f32.mrf.mxu1 }
 0x137   : > { %2470 = vmatmul.msk.f32.gmra.mxu0 %vm230_vm1, %v3440_v11 }
 0x138   : > { %2437 = vmatmul.msk.f32.gmra.mxu3 %vm230_vm1, %v3421_v30 }
 0x139   : > { %v757_v51 = vpop.f32.mrf.mxu2  ;;  %2370 = vmatmul.msk.f32.gmra.mxu1 %vm230_vm1, %v2998_v61  ;;  %v637_v61 = vadd.f32 %v636_v15, %v3326_v60 }
 0x13a   : > { %v841_v24 = vadd.f32 %v757_v51, %v634_v22  ;;  %v947_v22 = vrot.slane %v3460_v40, 1 }
 0x13b   : > { %v1068_v59 = vpop.f32.mrf.mxu3 }
 0x13c   : > { %v3453_v34 = vadd.f32 %v1068_v59, %v841_v24  ;;  %v3455_v6 = vpop.f32.mrf.mxu0 }
 0x13d   : > { %4297 = vst [vmem:[#allocation42_spill] sm:$0xff] %v3455_v6 }
 0x13e   : > { %4296 = vst [vmem:[#allocation41_spill] sm:$0xff] %v3453_v34  ;;  %2404 = vmatmul.msk.f32.gmra.mxu2 %vm230_vm1, %v2895_v28  ;;  %v639_v43 = vpop.f32.mrf.mxu1  ;;  %v3477_v34 = vsel %vm883_vm3, %v945_v46, %v947_v22 }
 0x13f   : > { %2471 = vmatmul.msk.f32.gmra.mxu0 %vm230_vm1, %v3458_v52  ;;  %v640_v15 = vadd.f32 %v639_v43, %v3142_v58  ;;  %v3497_v58 = vld [vmem:[#allocation2 + $0x148] sm:$0x3] }
 0x140   : > { %2438 = vmatmul.msk.f32.gmra.mxu3 %vm230_vm1, %v3440_v11 }
 0x141   : > { %v760_v51 = vpop.f32.mrf.mxu2  ;;  %2371 = vmatmul.msk.f32.gmra.mxu1 %vm230_vm1, %v3018_v2  ;;  %v949_v2 = vrot.slane %v2832_v12, 1 }
 0x142   : > { %v842_v54 = vadd.f32 %v760_v51, %v637_v61  ;;  %v950_v61 = vrot.slane %v2895_v28, 1 }
 0x143   : > { %v1071_v24 = vpop.f32.mrf.mxu3 }
 0x144   : > { %v3472_v59 = vadd.f32 %v1071_v24, %v842_v54  ;;  %v3474_v6 = vpop.f32.mrf.mxu0 }
 0x145   : > { %4298 = vst [vmem:[#allocation43_spill] sm:$0xff] %v3474_v6  ;;  %v3495_v6 = vsel %vm883_vm3, %v949_v2, %v950_v61 }
 0x146   : > { %2405 = vmatmul.msk.f32.gmra.mxu2 %vm230_vm1, %v2919_v38  ;;  %v642_v60 = vpop.f32.mrf.mxu1 }
 0x147   : > { %2472 = vmatmul.msk.f32.gmra.mxu0 %vm230_vm1, %v3477_v34 }
 0x148   : > { %2439 = vmatmul.msk.f32.gmra.mxu3 %vm230_vm1, %v3458_v52 }
 0x149   : > { %v763_v51 = vpop.f32.mrf.mxu2  ;;  %2372 = vmatmul.msk.f32.gmra.mxu1 %vm230_vm1, %v3034_v7  ;;  %v643_v7 = vadd.f32 %v642_v60, %v3161_v16 }
 0x14a   : > { %v843_v46 = vadd.f32 %v763_v51, %v640_v15  ;;  %v952_v15 = vrot.slane %v3497_v58, 1 }
 0x14b   : > { %v1074_v22 = vpop.f32.mrf.mxu3 }
 0x14c   : > { %v3490_v54 = vadd.f32 %v1074_v22, %v843_v46  ;;  %v3492_v24 = vpop.f32.mrf.mxu0 }
 0x14d   : > { %4300 = vst [vmem:[#allocation45_spill] sm:$0xff] %v3492_v24 }
 0x14e   : > { %4299 = vst [vmem:[#allocation44_spill] sm:$0xff] %v3490_v54  ;;  %2406 = vmatmul.msk.f32.gmra.mxu2 %vm230_vm1, %v2951_v50  ;;  %v645_v43 = vpop.f32.mrf.mxu1  ;;  %v3514_v54 = vsel %vm883_vm3, %v950_v61, %v952_v15 }
 0x14f   : > { %2473 = vmatmul.msk.f32.gmra.mxu0 %vm230_vm1, %v3495_v6  ;;  %v646_v60 = vadd.f32 %v645_v43, %v3186_v31  ;;  %v3534_v31 = vld [vmem:[#allocation2 + $0x160] sm:$0x3] }
 0x150   : > { %2440 = vmatmul.msk.f32.gmra.mxu3 %vm230_vm1, %v3477_v34 }
 0x151   : > { %v766_v51 = vpop.f32.mrf.mxu2  ;;  %2373 = vmatmul.msk.f32.gmra.mxu1 %vm230_vm1, %v2832_v12  ;;  %v954_v12 = vrot.slane %v2919_v38, 1 }
 0x152   : > { %v844_v2 = vadd.f32 %v766_v51, %v643_v7  ;;  %v955_v7 = vrot.slane %v2951_v50, 1 }
 0x153   : > { %v1077_v46 = vpop.f32.mrf.mxu3 }
 0x154   : > { %v3509_v22 = vadd.f32 %v1077_v46, %v844_v2  ;;  %v3511_v24 = vpop.f32.mrf.mxu0 }
 0x155   : > { %4302 = vst [vmem:[#allocation47_spill] sm:$0xff] %v3511_v24  ;;  %v3532_v24 = vsel %vm883_vm3, %v954_v12, %v955_v7  ;;  %v4257_v12 = vrot.slane %v3044_v14, 2 }
 0x156   : > { %4301 = vst [vmem:[#allocation46_spill] sm:$0xff] %v3509_v22  ;;  %2407 = vmatmul.msk.f32.gmra.mxu2 %vm230_vm1, %v2974_v56  ;;  %v648_v16 = vpop.f32.mrf.mxu1 }
 0x157   : > { %2474 = vmatmul.msk.f32.gmra.mxu0 %vm230_vm1, %v3514_v54 }
 0x158   : > { %2441 = vmatmul.msk.f32.gmra.mxu3 %vm230_vm1, %v3495_v6 }
 0x159   : > { %v769_v51 = vpop.f32.mrf.mxu2  ;;  %2374 = vmatmul.msk.f32.gmra.mxu1 %vm230_vm1, %v2895_v28  ;;  %v649_v28 = vadd.f32 %v648_v16, %v3206_v47 }
 0x15a   : > { %v845_v61 = vadd.f32 %v769_v51, %v646_v60  ;;  %v957_v60 = vrot.slane %v3534_v31, 1  ;;  %v1499_v51 = vrot.slane %v3042_v10, 2 }
 0x15b   : > { %v1080_v15 = vpop.f32.mrf.mxu3 }
 0x15c   : > { %v3527_v2 = vadd.f32 %v1080_v15, %v845_v61  ;;  %v3529_v46 = vpop.f32.mrf.mxu0  ;;  %v3553_v47 = vsel %vm883_vm3, %v955_v7, %v957_v60  ;;  %v3558_v10 = vsel %vm1498_vm4, %v1499_v51, %v4257_v12  ;;  %v959_v7 = vrot.slane %v2974_v56, 1 }
 0x15d   : > { %4304 = vst [vmem:[#allocation49_spill] sm:$0xff] %v3529_v46 }
 0x15e   : > { %4303 = vst [vmem:[#allocation48_spill] sm:$0xff] %v3527_v2  ;;  %2408 = vmatmul.msk.f32.gmra.mxu2 %vm230_vm1, %v3002_v63  ;;  %v651_v43 = vpop.f32.mrf.mxu1 }
 0x15f   : > { %2475 = vmatmul.msk.f32.gmra.mxu0 %vm230_vm1, %v3532_v24 }
 0x160   : > { %2442 = vmatmul.msk.f32.gmra.mxu3 %vm230_vm1, %v3514_v54 }
 0x161   : > { %v772_v61 = vpop.f32.mrf.mxu2  ;;  %2375 = vmatmul.msk.f32.gmra.mxu1 %vm230_vm1, %v2919_v38  ;;  %v652_v38 = vadd.f32 %v651_v43, %v3229_v39  ;;  %v3578_v39 = vld [vmem:[#allocation2 + $0x178] sm:$0x3] }
 0x162   : > { %v846_v15 = vadd.f32 %v772_v61, %v649_v28 }
 0x163   : > { %v1083_v46 = vpop.f32.mrf.mxu3 }
 0x164   : > { %v3548_v2 = vadd.f32 %v1083_v46, %v846_v15  ;;  %v3550_v22 = vpop.f32.mrf.mxu0  ;;  %v960_v46 = vrot.slane %v3002_v63, 1 }
 0x165   : > { %4305 = vst [vmem:[#allocation50_spill] sm:$0xff] %v3550_v22 }
 0x166   : > { %2409 = vmatmul.msk.f32.gmra.mxu2 %vm230_vm1, %v3022_v5  ;;  %v654_v16 = vpop.f32.mrf.mxu1  ;;  %v3576_v12 = vsel %vm883_vm3, %v959_v7, %v960_v46 }
 0x167   : > { %2476 = vmatmul.msk.f32.gmra.mxu0 %vm230_vm1, %v3553_v47 }
 0x168   : > { %2443 = vmatmul.msk.f32.gmra.mxu3 %vm230_vm1, %v3532_v24 }
 0x169   : > { %v775_v28 = vpop.f32.mrf.mxu2  ;;  %2376 = vmatmul.msk.f32.gmra.mxu1 %vm230_vm1, %v2951_v50  ;;  %v655_v50 = vadd.f32 %v654_v16, %v3249_v25  ;;  %v1180_v16 = vrot.slane %v3038_v9, 1 }
 0x16a   : > { %v847_v60 = vadd.f32 %v775_v28, %v652_v38  ;;  %v962_v38 = vrot.slane %v3578_v39, 1 }
 0x16b   : > { %v1086_v51 = vpop.f32.mrf.mxu3 }
 0x16c   : > { %v3571_v61 = vadd.f32 %v1086_v51, %v847_v60  ;;  %v3573_v15 = vpop.f32.mrf.mxu0  ;;  %v3590_v51 = vld [vmem:[#allocation2 + $0x198] sm:$0xff]  ;;  %v3597_v22 = vsel %vm883_vm3, %v960_v46, %v962_v38 }
 0x16d   : > { %4307 = vst [vmem:[#allocation52_spill] sm:$0xff] %v3573_v15 }
 0x16e   : > { %4306 = vst [vmem:[#allocation51_spill] sm:$0xff] %v3571_v61  ;;  %2410 = vmatmul.msk.f32.gmra.mxu2 %vm230_vm1, %v3038_v9  ;;  %v657_v43 = vpop.f32.mrf.mxu1  ;;  %v3619_v9 = vld [vmem:[#allocation2 + $0x190] sm:$0x3] }
 0x16f   : > { %2477 = vmatmul.msk.f32.gmra.mxu0 %vm230_vm1, %v3576_v12 }
 0x170   : > { %2444 = vmatmul.msk.f32.gmra.mxu3 %vm230_vm1, %v3553_v47 }
 0x171   : > { %v778_v28 = vpop.f32.mrf.mxu2  ;;  %2377 = vmatmul.msk.f32.gmra.mxu1 %vm230_vm1, %v2974_v56  ;;  %v1179_v56 = vrot.slane %v3022_v5, 1 }
 0x172   : > { %v848_v7 = vadd.f32 %v778_v28, %v655_v50  ;;  %v658_v50 = vadd.f32 %v657_v43, %v3272_v21  ;;  %v1182_v43 = vrot.slane %v3619_v9, 1 }
 0x173   : > { %v1089_v60 = vpop.f32.mrf.mxu3  ;;  %v3617_v5 = vsel %vm883_vm3, %v1179_v56, %v1180_v16  ;;  %v1505_v56 = vrot.slane %v2915_v36, 2  ;;  %v1502_v36 = vrot.slane %v3059_v19, 2 }
 0x174   : > { %v3592_v15 = vadd.f32 %v1089_v60, %v848_v7  ;;  %v3594_v61 = vpop.f32.mrf.mxu0  ;;  %v3610_v7 = vld [vmem:[#allocation2 + $0x1a0] sm:$0xff] }
 0x175   : > { %4308 = vst [vmem:[#allocation53_spill] sm:$0xff] %v3594_v61 }
 0x176   : > { %2411 = vmatmul.msk.f32.gmra.mxu2 %vm230_vm1, %v3590_v51  ;;  %v660_v25 = vpop.f32.mrf.mxu1 }
 0x177   : > { %2478 = vmatmul.msk.f32.gmra.mxu0 %vm230_vm1, %v3597_v22 }
 0x178   : > { %2445 = vmatmul.msk.f32.gmra.mxu3 %vm230_vm1, %v3576_v12 }
 0x179   : > { %v781_v28 = vpop.f32.mrf.mxu2  ;;  %2378 = vmatmul.msk.f32.gmra.mxu1 %vm230_vm1, %v3002_v63  ;;  %v661_v63 = vadd.f32 %v660_v25, %v3292_v8  ;;  %v3638_v8 = vsel %vm883_vm3, %v1180_v16, %v1182_v43 }
 0x17a   : > { %v849_v46 = vadd.f32 %v781_v28, %v658_v50  ;;  %v1504_v50 = vrot.slane %v2889_v26, 2 }
 0x17b   : > { %v1092_v38 = vpop.f32.mrf.mxu3 }
 0x17c   : > { %v3612_v60 = vadd.f32 %v1092_v38, %v849_v46  ;;  %v3614_v61 = vpop.f32.mrf.mxu0  ;;  %v1506_v25 = vsel %vm1498_vm4, %v1504_v50, %v1505_v56 }
 0x17d   : > { %4310 = vst [vmem:[#allocation55_spill] sm:$0xff] %v3614_v61 }
 0x17e   : > { %4309 = vst [vmem:[#allocation54_spill] sm:$0xff] %v3612_v60  ;;  %2412 = vmatmul.msk.f32.gmra.mxu2 %vm230_vm1, %v3610_v7  ;;  %v663_v21 = vpop.f32.mrf.mxu1 }
 0x17f   : > { %2479 = vmatmul.msk.f32.gmra.mxu0 %vm230_vm1, %v3617_v5 }
 0x180   : > { %2446 = vmatmul.msk.f32.gmra.mxu3 %vm230_vm1, %v3597_v22 }
 0x181   : > { %v784_v28 = vpop.f32.mrf.mxu2  ;;  %2483 = vmatmul.msk.f32.vlgmr.msra.gmra.mxu1 %vm230_vm1, %v3090_v35  ;;  %v1509_v35 = vrot.slane %v2947_v48, 2 }
 0x182   : > { %v850_v46 = vadd.f32 %v784_v28, %v661_v63  ;;  %v1510_v63 = vrot.slane %v2972_v55, 2  ;;  %v664_v28 = vadd.f32 %v663_v21, %v3167_v18 }
 0x183   : > { %v1095_v38 = vpop.f32.mrf.mxu3 }
 0x184   : > { %v3633_v61 = vadd.f32 %v1095_v38, %v850_v46  ;;  %v3635_v60 = vpop.f32.mrf.mxu0  ;;  %v4311_v46 = vrot.slane %v3044_v14, 2  ;;  %v1511_v55 = vsel %vm1498_vm4, %v1509_v35, %v1510_v63  ;;  %v1512_v14 = vrot.slane %v3092_v37, 2 }
 0x185   : > { %v1514_v37 = vrot.slane %v3000_v62, 2  ;;  %v4312_v62 = vld [vmem:[#allocation17_spill] sm:$0xff] }
 0x186   : > { %2517 = vmatmul.msk.f32.vlgmr.msra.gmra.mxu2 %vm230_vm1, %v3558_v10  ;;  %v666_v26 = vpop.f32.mrf.mxu1  ;;  %v1507_v10 = vrot.slane %v3071_v27, 2  ;;  %v1503_v19 = vsel %vm1498_vm4, %v4311_v46, %v1502_v36 }
 0x187   : > { %2480 = vmatmul.msk.f32.gmra.mxu0 %vm230_vm1, %v3638_v8  ;;  %v667_v27 = vadd.f32 %v666_v26, %v3193_v33 }
 0x188   : > { %2551 = vmatmul.msk.f32.vlgmr.msra.gmra.mxu3 %vm230_vm1, %v1506_v25  ;;  %v1508_v18 = vsel %vm1498_vm4, %v1505_v56, %v1507_v10 }
 0x189   : > { %v787_v16 = vpop.f32.mrf.mxu2  ;;  %2484 = vmatmul.msk.f32.gmra.mxu1 %vm230_vm1, %v3103_v41 }
 0x18a   : > { %v851_v43 = vadd.f32 %v787_v16, %v664_v28  ;;  %v1513_v16 = vsel %vm1498_vm4, %v1510_v63, %v1512_v14 }
 0x18b   : > { %v1098_v50 = vpop.f32.mrf.mxu3 }
 0x18c   : > { %v3656_v38 = vadd.f32 %v1098_v50, %v851_v43  ;;  %v3658_v48 = vpop.f32.mrf.mxu0 }
 0x18e   : > { %2518 = vmatmul.msk.f32.gmra.mxu2 %vm230_vm1, %v1503_v19  ;;  %v669_v21 = vpop.f32.mrf.mxu1 }
 0x18f   : > { %2585 = vmatmul.msk.f32.vlgmr.msra.gmra.mxu0 %vm230_vm1, %v1511_v55  ;;  %v670_v33 = vadd.f32 %v669_v21, %v3214_v53 }
 0x190   : > { %2552 = vmatmul.msk.f32.gmra.mxu3 %vm230_vm1, %v1508_v18 }
 0x191   : > { %v790_v41 = vpop.f32.mrf.mxu2  ;;  %2485 = vmatmul.msk.f32.gmra.mxu1 %vm230_vm1, %v3116_v44  ;;  %v1515_v44 = vrot.slane %v3020_v4, 2  ;;  %v4313_v4 = vld [vmem:[#allocation5_spill] sm:$0xff] }
 0x192   : > { %v852_v36 = vadd.f32 %v790_v41, %v667_v27  ;;  %v1517_v21 = vrot.slane %v4313_v4, 2  ;;  %v4314_v27 = vld [vmem:[#allocation6_spill] sm:$0xff]  ;;  %v4318_v4 = vld [vmem:[#allocation8_spill] sm:$0xff] }
 0x193   : > { %v1101_v28 = vpop.f32.mrf.mxu3  ;;  %v1516_v46 = vsel %vm1498_vm4, %v1514_v37, %v1515_v44 }
 0x194   : > { %v3669_v35 = vadd.f32 %v1101_v28, %v852_v36  ;;  %v3671_v56 = vpop.f32.mrf.mxu0 }
 0x196   : > { %2519 = vmatmul.msk.f32.gmra.mxu2 %vm230_vm1, %v1506_v25  ;;  %v672_v10 = vpop.f32.mrf.mxu1 }
 0x197   : > { %2586 = vmatmul.msk.f32.gmra.mxu0 %vm230_vm1, %v1513_v16  ;;  %v673_v19 = vadd.f32 %v672_v10, %v4312_v62  ;;  %v4315_v10 = vld [vmem:[#allocation20_spill] sm:$0xff] }
 0x198   : > { %2553 = vmatmul.msk.f32.gmra.mxu3 %vm230_vm1, %v1511_v55 }
 0x199   : > { %v793_v26 = vpop.f32.mrf.mxu2  ;;  %2486 = vmatmul.msk.f32.gmra.mxu1 %vm230_vm1, %v3130_v49 }
 0x19a   : > { %v853_v43 = vadd.f32 %v793_v26, %v670_v33  ;;  %v4316_v26 = vld [vmem:[#allocation3_spill] sm:$0xff] }
 0x19b   : > { %v1104_v50 = vpop.f32.mrf.mxu3 }
 0x19c   : > { %v3682_v63 = vadd.f32 %v1104_v50, %v853_v43  ;;  %v3684_v25 = vpop.f32.mrf.mxu0  ;;  %v1519_v43 = vrot.slane %v4316_v26, 2  ;;  %v4317_v50 = vld [vmem:[#allocation4_spill] sm:$0xff] }
 0x19d   : > { %v1520_v62 = vrot.slane %v4317_v50, 2 }
 0x19e   : > { %2520 = vmatmul.msk.f32.gmra.mxu2 %vm230_vm1, %v1508_v18  ;;  %v675_v53 = vpop.f32.mrf.mxu1  ;;  %v1518_v18 = vsel %vm1498_vm4, %v1515_v44, %v1517_v21 }
 0x19f   : > { %2587 = vmatmul.msk.f32.gmra.mxu0 %vm230_vm1, %v1516_v46  ;;  %v676_v37 = vadd.f32 %v675_v53, %v4315_v10  ;;  %v1521_v21 = vsel %vm1498_vm4, %v1519_v43, %v1520_v62  ;;  %v4321_v10 = vld [vmem:[#allocation7_spill] sm:$0xff] }
 0x1a0   : > { %2554 = vmatmul.msk.f32.gmra.mxu3 %vm230_vm1, %v1513_v16  ;;  %v1522_v26 = vrot.slane %v4321_v10, 2  ;;  %v2635_v10 = vld [vmem:[#allocation2 + $0x78] sm:$0xff] }
 0x1a1   : > { %v796_v49 = vpop.f32.mrf.mxu2  ;;  %2487 = vmatmul.msk.f32.gmra.mxu1 %vm230_vm1, %v4314_v27 }
 0x1a2   : > { %v854_v14 = vadd.f32 %v796_v49, %v673_v19 }
 0x1a3   : > { %v1107_v41 = vpop.f32.mrf.mxu3 }
 0x1a4   : > { %v3694_v36 = vadd.f32 %v1107_v41, %v854_v14  ;;  %v3696_v28 = vpop.f32.mrf.mxu0  ;;  %v4320_v14 = vld [vmem:[#allocation24_spill] sm:$0xff] }
 0x1a6   : > { %2521 = vmatmul.msk.f32.gmra.mxu2 %vm230_vm1, %v1511_v55  ;;  %v678_v33 = vpop.f32.mrf.mxu1 }
 0x1a7   : > { %2588 = vmatmul.msk.f32.gmra.mxu0 %vm230_vm1, %v1518_v18  ;;  %v679_v41 = vadd.f32 %v678_v33, %v4320_v14  ;;  %v4325_v33 = vld [vmem:[#allocation27_spill] sm:$0xff] }
 0x1a8   : > { %2555 = vmatmul.msk.f32.gmra.mxu3 %vm230_vm1, %v1516_v46 }
 0x1a9   : > { %v799_v19 = vpop.f32.mrf.mxu2  ;;  %2488 = vmatmul.msk.f32.gmra.mxu1 %vm230_vm1, %v4318_v4 }
 0x1aa   : > { %v855_v49 = vadd.f32 %v799_v19, %v676_v37  ;;  %v4322_v37 = vld [vmem:[#allocation10_spill] sm:$0xff] }
 0x1ab   : > { %v1110_v27 = vpop.f32.mrf.mxu3 }
 0x1ac   : > { %v3707_v44 = vadd.f32 %v1110_v27, %v855_v49  ;;  %v3709_v55 = vpop.f32.mrf.mxu0 }
 0x1ad   : > { %4319 = vst [vmem:[#allocation17_spill] sm:$0xff] %v3709_v55  ;;  %v1524_v55 = vrot.slane %v2635_v10, 2 }
 0x1ae   : > { %2522 = vmatmul.msk.f32.gmra.mxu2 %vm230_vm1, %v1513_v16  ;;  %v681_v53 = vpop.f32.mrf.mxu1  ;;  %v1523_v16 = vsel %vm1498_vm4, %v1520_v62, %v1522_v26 }
 0x1af   : > { %2589 = vmatmul.msk.f32.gmra.mxu0 %vm230_vm1, %v1521_v21  ;;  %v682_v14 = vadd.f32 %v681_v53, %v4325_v33  ;;  %v4329_v33 = vld [vmem:[#allocation30_spill] sm:$0xff] }
 0x1b0   : > { %2556 = vmatmul.msk.f32.gmra.mxu3 %vm230_vm1, %v1518_v18 }
 0x1b1   : > { %v802_v50 = vpop.f32.mrf.mxu2  ;;  %2489 = vmatmul.msk.f32.gmra.mxu1 %vm230_vm1, %v4322_v37  ;;  %v2636_v37 = vld [vmem:[#allocation2 + $0x80] sm:$0xff] }
 0x1b2   : > { %v856_v19 = vadd.f32 %v802_v50, %v679_v41  ;;  %v1525_v41 = vrot.slane %v2636_v37, 2  ;;  %v4330_v37 = vld [vmem:[#allocation11_spill] sm:$0xff] }
 0x1b3   : > { %v1113_v4 = vpop.f32.mrf.mxu3 }
 0x1b4   : > { %v3719_v49 = vadd.f32 %v1113_v4, %v856_v19  ;;  %v3721_v43 = vpop.f32.mrf.mxu0  ;;  %v4326_v19 = vld [vmem:[#allocation13_spill] sm:$0xff]  ;;  %v1526_v26 = vsel %vm1498_vm4, %v1524_v55, %v1525_v41 }
 0x1b5   : > { %4324 = vst [vmem:[#allocation6_spill] sm:$0xff] %v3721_v43 }
 0x1b6   : > { %4323 = vst [vmem:[#allocation5_spill] sm:$0xff] %v3719_v49  ;;  %2523 = vmatmul.msk.f32.gmra.mxu2 %vm230_vm1, %v1516_v46  ;;  %v684_v27 = vpop.f32.mrf.mxu1  ;;  %v1527_v49 = vrot.slane %v4330_v37, 2  ;;  %v2637_v37 = vld [vmem:[#allocation2 + $0x90] sm:$0xff] }
 0x1b7   : > { %2590 = vmatmul.msk.f32.gmra.mxu0 %vm230_vm1, %v1523_v16  ;;  %v685_v10 = vadd.f32 %v684_v27, %v4329_v33  ;;  %v4334_v27 = vld [vmem:[#allocation9_spill] sm:$0xff] }
 0x1b8   : > { %2557 = vmatmul.msk.f32.gmra.mxu3 %vm230_vm1, %v1521_v21 }
 0x1b9   : > { %v805_v50 = vpop.f32.mrf.mxu2  ;;  %2490 = vmatmul.msk.f32.gmra.mxu1 %vm230_vm1, %v4326_v19 }
 0x1ba   : > { %v857_v4 = vadd.f32 %v805_v50, %v682_v14  ;;  %v4331_v14 = vld [vmem:[#allocation15_spill] sm:$0xff] }
 0x1bb   : > { %v1116_v43 = vpop.f32.mrf.mxu3 }
 0x1bc   : > { %v3730_v62 = vadd.f32 %v1116_v43, %v857_v4  ;;  %v3732_v46 = vpop.f32.mrf.mxu0 }
 0x1bd   : > { %4328 = vst [vmem:[#allocation3_spill] sm:$0xff] %v3732_v46 }
 0x1be   : > { %4327 = vst [vmem:[#allocation20_spill] sm:$0xff] %v3730_v62  ;;  %2524 = vmatmul.msk.f32.gmra.mxu2 %vm230_vm1, %v1518_v18  ;;  %v687_v53 = vpop.f32.mrf.mxu1  ;;  %v1528_v18 = vsel %vm1498_vm4, %v1525_v41, %v1527_v49  ;;  %v1529_v62 = vrot.slane %v2637_v37, 2 }
 0x1bf   : > { %2591 = vmatmul.msk.f32.gmra.mxu0 %vm230_vm1, %v1526_v26  ;;  %v688_v33 = vadd.f32 %v687_v53, %v4334_v27  ;;  %v4338_v27 = vld [vmem:[#allocation12_spill] sm:$0xff] }
 0x1c0   : > { %2558 = vmatmul.msk.f32.gmra.mxu3 %vm230_vm1, %v1523_v16 }
 0x1c1   : > { %v808_v19 = vpop.f32.mrf.mxu2  ;;  %2491 = vmatmul.msk.f32.gmra.mxu1 %vm230_vm1, %v4331_v14  ;;  %v2638_v14 = vld [vmem:[#allocation2 + $0x98] sm:$0xff] }
 0x1c2   : > { %v858_v43 = vadd.f32 %v808_v19, %v685_v10  ;;  %v1530_v10 = vrot.slane %v2638_v14, 2  ;;  %v4339_v14 = vld [vmem:[#allocation16_spill] sm:$0xff] }
 0x1c3   : > { %v1119_v50 = vpop.f32.mrf.mxu3 }
 0x1c4   : > { %v3742_v4 = vadd.f32 %v1119_v50, %v858_v43  ;;  %v3744_v55 = vpop.f32.mrf.mxu0  ;;  %v4335_v43 = vld [vmem:[#allocation19_spill] sm:$0xff]  ;;  %v1531_v41 = vsel %vm1498_vm4, %v1529_v62, %v1530_v10 }
 0x1c5   : > { %4333 = vst [vmem:[#allocation8_spill] sm:$0xff] %v3744_v55 }
 0x1c6   : > { %4332 = vst [vmem:[#allocation4_spill] sm:$0xff] %v3742_v4  ;;  %2525 = vmatmul.msk.f32.gmra.mxu2 %vm230_vm1, %v1521_v21  ;;  %v690_v46 = vpop.f32.mrf.mxu1  ;;  %v1532_v4 = vrot.slane %v4339_v14, 2  ;;  %v2639_v14 = vld [vmem:[#allocation2 + $0xa8] sm:$0xff] }
 0x1c7   : > { %2592 = vmatmul.msk.f32.gmra.mxu0 %vm230_vm1, %v1528_v18  ;;  %v691_v37 = vadd.f32 %v690_v46, %v4338_v27  ;;  %v4343_v46 = vld [vmem:[#allocation14_spill] sm:$0xff] }
 0x1c8   : > { %2559 = vmatmul.msk.f32.gmra.mxu3 %vm230_vm1, %v1526_v26 }
 0x1c9   : > { %v811_v19 = vpop.f32.mrf.mxu2  ;;  %2492 = vmatmul.msk.f32.gmra.mxu1 %vm230_vm1, %v4335_v43 }
 0x1ca   : > { %v859_v50 = vadd.f32 %v811_v19, %v688_v33  ;;  %v4340_v33 = vld [vmem:[#allocation22_spill] sm:$0xff] }
 0x1cb   : > { %v1122_v55 = vpop.f32.mrf.mxu3 }
 0x1cc   : > { %v3753_v49 = vadd.f32 %v1122_v55, %v859_v50  ;;  %v3755_v21 = vpop.f32.mrf.mxu0 }
 0x1cd   : > { %4337 = vst [vmem:[#allocation7_spill] sm:$0xff] %v3755_v21 }
 0x1ce   : > { %4336 = vst [vmem:[#allocation24_spill] sm:$0xff] %v3753_v49  ;;  %2526 = vmatmul.msk.f32.gmra.mxu2 %vm230_vm1, %v1523_v16  ;;  %v693_v53 = vpop.f32.mrf.mxu1  ;;  %v1533_v16 = vsel %vm1498_vm4, %v1530_v10, %v1532_v4  ;;  %v1534_v49 = vrot.slane %v2639_v14, 2 }
 0x1cf   : > { %2593 = vmatmul.msk.f32.gmra.mxu0 %vm230_vm1, %v1531_v41  ;;  %v694_v27 = vadd.f32 %v693_v53, %v4343_v46  ;;  %v4346_v46 = vld [vmem:[#allocation18_spill] sm:$0xff] }
 0x1d0   : > { %2560 = vmatmul.msk.f32.gmra.mxu3 %vm230_vm1, %v1528_v18 }
 0x1d1   : > { %v814_v43 = vpop.f32.mrf.mxu2  ;;  %2493 = vmatmul.msk.f32.gmra.mxu1 %vm230_vm1, %v4340_v33  ;;  %v2640_v33 = vld [vmem:[#allocation2 + $0xb0] sm:$0xff] }
 0x1d2   : > { %v860_v55 = vadd.f32 %v814_v43, %v691_v37  ;;  %v1535_v37 = vrot.slane %v2640_v33, 2  ;;  %v4347_v33 = vld [vmem:[#allocation23_spill] sm:$0xff] }
 0x1d3   : > { %v1125_v19 = vpop.f32.mrf.mxu3 }
 0x1d4   : > { %v3765_v50 = vadd.f32 %v1125_v19, %v860_v55  ;;  %v3767_v62 = vpop.f32.mrf.mxu0  ;;  %v4344_v55 = vld [vmem:[#allocation26_spill] sm:$0xff]  ;;  %v1536_v10 = vsel %vm1498_vm4, %v1534_v49, %v1535_v37 }
 0x1d5   : > { %4342 = vst [vmem:[#allocation27_spill] sm:$0xff] %v3767_v62 }
 0x1d6   : > { %4341 = vst [vmem:[#allocation10_spill] sm:$0xff] %v3765_v50  ;;  %2527 = vmatmul.msk.f32.gmra.mxu2 %vm230_vm1, %v1526_v26  ;;  %v696_v21 = vpop.f32.mrf.mxu1  ;;  %v1537_v50 = vrot.slane %v4347_v33, 2  ;;  %v2641_v33 = vld [vmem:[#allocation2 + $0xc0] sm:$0xff] }
 0x1d7   : > { %2594 = vmatmul.msk.f32.gmra.mxu0 %vm230_vm1, %v1533_v16  ;;  %v697_v14 = vadd.f32 %v696_v21, %v4346_v46  ;;  %v4349_v21 = vld [vmem:[#allocation21_spill] sm:$0xff] }
 0x1d8   : > { %2561 = vmatmul.msk.f32.gmra.mxu3 %vm230_vm1, %v1531_v41 }
 0x1d9   : > { %v817_v43 = vpop.f32.mrf.mxu2  ;;  %2494 = vmatmul.msk.f32.gmra.mxu1 %vm230_vm1, %v4344_v55 }
 0x1da   : > { %v861_v19 = vadd.f32 %v817_v43, %v694_v27 }
 0x1db   : > { %v1128_v62 = vpop.f32.mrf.mxu3 }
 0x1dc   : > { %v3776_v4 = vadd.f32 %v1128_v62, %v861_v19  ;;  %v3778_v26 = vpop.f32.mrf.mxu0 }
 0x1dd   : > { %4345 = vst [vmem:[#allocation13_spill] sm:$0xff] %v3778_v26  ;;  %v1539_v26 = vrot.slane %v2641_v33, 2 }
 0x1de   : > { %2528 = vmatmul.msk.f32.gmra.mxu2 %vm230_vm1, %v1528_v18  ;;  %v699_v53 = vpop.f32.mrf.mxu1  ;;  %v1538_v18 = vsel %vm1498_vm4, %v1535_v37, %v1537_v50 }
 0x1df   : > { %2595 = vmatmul.msk.f32.gmra.mxu0 %vm230_vm1, %v1536_v10  ;;  %v700_v46 = vadd.f32 %v699_v53, %v4349_v21  ;;  %v4351_v21 = vld [vmem:[#allocation25_spill] sm:$0xff] }
 0x1e0   : > { %2562 = vmatmul.msk.f32.gmra.mxu3 %vm230_vm1, %v1533_v16 }
 0x1e1   : > { %v820_v55 = vpop.f32.mrf.mxu2  ;;  %2495 = vmatmul.msk.f32.gmra.mxu1 %vm230_vm1, %v3309_v29  ;;  %v2642_v29 = vld [vmem:[#allocation2 + $0xc8] sm:$0xff] }
 0x1e2   : > { %v862_v62 = vadd.f32 %v820_v55, %v697_v14  ;;  %v1540_v14 = vrot.slane %v2642_v29, 2  ;;  %v4352_v29 = vld [vmem:[#allocation29_spill] sm:$0xff] }
 0x1e3   : > { %v1131_v27 = vpop.f32.mrf.mxu3 }
 0x1e4   : > { %v3788_v43 = vadd.f32 %v1131_v27, %v862_v62  ;;  %v3790_v49 = vpop.f32.mrf.mxu0  ;;  %v1541_v37 = vsel %vm1498_vm4, %v1539_v26, %v1540_v14 }
 0x1e5   : > { %4348 = vst [vmem:[#allocation30_spill] sm:$0xff] %v3790_v49  ;;  %v1542_v49 = vrot.slane %v4352_v29, 2  ;;  %v2643_v29 = vld [vmem:[#allocation2 + $0xd8] sm:$0xff] }
 0x1e6   : > { %2529 = vmatmul.msk.f32.gmra.mxu2 %vm230_vm1, %v1531_v41  ;;  %v702_v19 = vpop.f32.mrf.mxu1 }
 0x1e7   : > { %2596 = vmatmul.msk.f32.gmra.mxu0 %vm230_vm1, %v1538_v18  ;;  %v703_v33 = vadd.f32 %v702_v19, %v4351_v21  ;;  %v4353_v19 = vld [vmem:[#allocation28_spill] sm:$0xff] }
 0x1e8   : > { %2563 = vmatmul.msk.f32.gmra.mxu3 %vm230_vm1, %v1536_v10 }
 0x1e9   : > { %v823_v55 = vpop.f32.mrf.mxu2  ;;  %2496 = vmatmul.msk.f32.gmra.mxu1 %vm230_vm1, %v3329_v32 }
 0x1ea   : > { %v863_v62 = vadd.f32 %v823_v55, %v700_v46 }
 0x1eb   : > { %v1134_v27 = vpop.f32.mrf.mxu3 }
 0x1ec   : > { %v3799_v50 = vadd.f32 %v1134_v27, %v863_v62  ;;  %v3801_v41 = vpop.f32.mrf.mxu0 }
 0x1ed   : > { %4350 = vst [vmem:[#allocation11_spill] sm:$0xff] %v3801_v41  ;;  %v1544_v41 = vrot.slane %v2643_v29, 2 }
 0x1ee   : > { %2530 = vmatmul.msk.f32.gmra.mxu2 %vm230_vm1, %v1533_v16  ;;  %v705_v53 = vpop.f32.mrf.mxu1  ;;  %v1543_v16 = vsel %vm1498_vm4, %v1540_v14, %v1542_v49 }
 0x1ef   : > { %2597 = vmatmul.msk.f32.gmra.mxu0 %vm230_vm1, %v1541_v37  ;;  %v706_v21 = vadd.f32 %v705_v53, %v4353_v19  ;;  %v4355_v19 = vld [vmem:[#allocation31_spill] sm:$0xff] }
 0x1f0   : > { %2564 = vmatmul.msk.f32.gmra.mxu3 %vm230_vm1, %v1538_v18 }
 0x1f1   : > { %v826_v32 = vpop.f32.mrf.mxu2  ;;  %2497 = vmatmul.msk.f32.gmra.mxu1 %vm230_vm1, %v3347_v1  ;;  %v2644_v1 = vld [vmem:[#allocation2 + $0xe0] sm:$0xff] }
 0x1f2   : > { %v864_v46 = vadd.f32 %v826_v32, %v703_v33  ;;  %v1545_v33 = vrot.slane %v2644_v1, 2  ;;  %v1547_v1 = vrot.slane %v3349_v23, 2 }
 0x1f3   : > { %v1137_v55 = vpop.f32.mrf.mxu3 }
 0x1f4   : > { %v3811_v62 = vadd.f32 %v1137_v55, %v864_v46  ;;  %v3813_v26 = vpop.f32.mrf.mxu0  ;;  %v1546_v14 = vsel %vm1498_vm4, %v1544_v41, %v1545_v33 }
 0x1f6   : > { %2531 = vmatmul.msk.f32.gmra.mxu2 %vm230_vm1, %v1536_v10  ;;  %v708_v27 = vpop.f32.mrf.mxu1 }
 0x1f7   : > { %2598 = vmatmul.msk.f32.gmra.mxu0 %vm230_vm1, %v1543_v16  ;;  %v709_v29 = vadd.f32 %v708_v27, %v4355_v19 }
 0x1f8   : > { %2565 = vmatmul.msk.f32.gmra.mxu3 %vm230_vm1, %v1541_v37 }
 0x1f9   : > { %v829_v32 = vpop.f32.mrf.mxu2  ;;  %2498 = vmatmul.msk.f32.gmra.mxu1 %vm230_vm1, %v3366_v3 }
 0x1fa   : > { %v865_v46 = vadd.f32 %v829_v32, %v706_v21 }
 0x1fb   : > { %v1140_v55 = vpop.f32.mrf.mxu3 }
 0x1fc   : > { %v3822_v49 = vadd.f32 %v1140_v55, %v865_v46  ;;  %v3824_v10 = vpop.f32.mrf.mxu0  ;;  %v4357_v55 = vld [vmem:[#allocation32_spill] sm:$0xff] }
 0x1fd   : > { %4354 = vst [vmem:[#allocation15_spill] sm:$0xff] %v3824_v10  ;;  %v4358_v10 = vld [vmem:[#allocation33_spill] sm:$0xff] }
 0x1fe   : > { %2532 = vmatmul.msk.f32.gmra.mxu2 %vm230_vm1, %v1538_v18  ;;  %v1370_v53 = vpop.f32.mrf.mxu1  ;;  %v3839_v18 = vsel %vm1498_vm4, %v1545_v33, %v1547_v1  ;;  %v1306_v27 = vadd.f32 %v4358_v10, %v4357_v55 }
 0x1ff   : > { %2599 = vmatmul.msk.f32.gmra.mxu0 %vm230_vm1, %v1546_v14 }
 0x200   : > { %2566 = vmatmul.msk.f32.gmra.mxu3 %vm230_vm1, %v1543_v16  ;;  %v1466_v23 = vadd.f32 %v1370_v53, %v1306_v27  ;;  %v4359_v27 = vld [vmem:[#allocation34_spill] sm:$0xff] }
 0x201   : > { %v832_v3 = vpop.f32.mrf.mxu2  ;;  %2499 = vmatmul.msk.f32.gmra.mxu1 %vm230_vm1, %v3384_v45  ;;  %v2645_v45 = vld [vmem:[#allocation2 + $0xf0] sm:$0xff] }
 0x202   : > { %v866_v21 = vadd.f32 %v832_v3, %v709_v29  ;;  %v1549_v29 = vrot.slane %v2645_v45, 2  ;;  %v2646_v3 = vld [vmem:[#allocation2 + $0xf8] sm:$0xff]  ;;  %v1307_v45 = vadd.f32 %v4359_v27, %v3361_v57  ;;  %v1552_v57 = vrot.slane %v3386_v20, 2 }
 0x203   : > { %v1143_v32 = vpop.f32.mrf.mxu3 }
 0x204   : > { %v3834_v46 = vadd.f32 %v1143_v32, %v866_v21  ;;  %v3836_v41 = vpop.f32.mrf.mxu0  ;;  %v1550_v21 = vrot.slane %v2646_v3, 2 }
 0x205   : > { %4356 = vst [vmem:[#allocation9_spill] sm:$0xff] %v3836_v41 }
 0x206   : > { %2533 = vmatmul.msk.f32.gmra.mxu2 %vm230_vm1, %v1541_v37  ;;  %v1373_v19 = vpop.f32.mrf.mxu1  ;;  %v3852_v37 = vld [vmem:[%s4238_s2] ss:$0 sm:$0xff]  ;;  %v3855_v53 = vsel %vm1498_vm4, %v1549_v29, %v1550_v21  ;;  %v3882_v20 = vsel %vm1498_vm4, %v1550_v21, %v1552_v57  ;;  %v2647_v21 = vld [vmem:[#allocation2 + $0x108] sm:$0xff] }
 0x207   : > { %2600 = vmatmul.msk.f32.gmra.mxu0 %vm230_vm1, %v3839_v18  ;;  %v1554_v57 = vrot.slane %v2647_v21, 2 }
 0x208   : > { %2567 = vmatmul.msk.f32.gmra.mxu3 %vm230_vm1, %v1546_v14 }
 0x209   : > { %v1665_v32 = vpop.f32.mrf.mxu2  ;;  %2500 = vmatmul.msk.f32.gmra.mxu1 %vm230_vm1, %v3403_v0  ;;  %v3862_v0 = vld [vmem:[%s4239_s3] ss:$0 sm:$0xff] }
 0x20a   : > { %v1761_v33 = vadd.f32 %v1665_v32, %v1466_v23  ;;  %v1467_v32 = vadd.f32 %v1373_v19, %v1307_v45  ;;  %v4360_v45 = vld [vmem:[#allocation35_spill] sm:$0xff] }
 0x20b   : > { %v1824_v1 = vpop.f32.mrf.mxu3 }
 0x20c   : > { %v1920_v10 = vadd.f32 %v1824_v1, %v1761_v33  ;;  %v1983_v55 = vpop.f32.mrf.mxu0 }
 0x20e   : > { %v2079_v3 = vadd.f32 %v1983_v55, %v1920_v10  ;;  %2534 = vmatmul.msk.f32.gmra.mxu2 %vm230_vm1, %v1543_v16  ;;  %v1376_v23 = vpop.f32.mrf.mxu1 }
 0x20f   : > { %2601 = vmatmul.msk.f32.gmra.mxu0 %vm230_vm1, %v3855_v53 }
 0x210   : > { %v2115_v33 = vmul.f32 %v3852_v37, %v2079_v3  ;;  %2568 = vmatmul.msk.f32.gmra.mxu3 %vm230_vm1, %v3839_v18 }
 0x211   : > { %v1668_v29 = vpop.f32.mrf.mxu2  ;;  %2501 = vmatmul.msk.f32.gmra.mxu1 %vm230_vm1, %v3421_v30  ;;  %v4361_v30 = vld [vmem:[#allocation36_spill] sm:$0xff] }
 0x212   : > { %v2151_v1 = vadd.f32 %v3862_v0, %v2115_v33  ;;  %v1762_v10 = vadd.f32 %v1668_v29, %v1467_v32  ;;  %v1308_v3 = vadd.f32 %v4361_v30, %v4360_v45 }
 0x213   : > { %v1827_v16 = vpop.f32.mrf.mxu3 }
 0x214   : > { %v2183_v19 = vmax.f32 %v2151_v1, 0.0  ;;  %v1921_v55 = vadd.f32 %v1827_v16, %v1762_v10  ;;  %v1986_v27 = vpop.f32.mrf.mxu0  ;;  %v1468_v29 = vadd.f32 %v1376_v23, %v1308_v3  ;;  %v2648_v10 = vld [vmem:[#allocation2 + $0x110] sm:$0xff] }
 0x215   : > { %v1555_v16 = vrot.slane %v2648_v10, 2 }
 0x216   : > { %2216 = vst.msk [vmem:[%s3879_s22] sm:$0xff] %vm2215_vm5, %v2183_v19  ;;  %v2080_v32 = vadd.f32 %v1986_v27, %v1921_v55  ;;  %2535 = vmatmul.msk.f32.gmra.mxu2 %vm230_vm1, %v1546_v14  ;;  %v1379_v33 = vpop.f32.mrf.mxu1 }
 0x217   : > { %2602 = vmatmul.msk.f32.gmra.mxu0 %vm230_vm1, %v3882_v20  ;;  %v3898_v3 = vsel %vm1498_vm4, %v1554_v57, %v1555_v16  ;;  %v1557_v57 = vrot.slane %v3423_v13, 2 }
 0x218   : > { %v2116_v1 = vmul.f32 %v3852_v37, %v2080_v32  ;;  %2569 = vmatmul.msk.f32.gmra.mxu3 %vm230_vm1, %v3855_v53  ;;  %v4362_v32 = vld [vmem:[#allocation37_spill] sm:$0xff] }
 0x219   : > { %v1671_v45 = vpop.f32.mrf.mxu2  ;;  %2502 = vmatmul.msk.f32.gmra.mxu1 %vm230_vm1, %v3440_v11  ;;  %v1309_v41 = vadd.f32 %v4362_v32, %v3398_v17 }
 0x21a   : > { %v2152_v14 = vadd.f32 %v3862_v0, %v2116_v1  ;;  %v1763_v19 = vadd.f32 %v1671_v45, %v1468_v29 }
 0x21b   : > { %v1830_v55 = vpop.f32.mrf.mxu3  ;;  %v1469_v29 = vadd.f32 %v1379_v33, %v1309_v41  ;;  %v3916_v41 = vsel %vm1498_vm4, %v1555_v16, %v1557_v57  ;;  %v4363_v33 = vld [vmem:[#allocation38_spill] sm:$0xff]  ;;  %v2649_v16 = vld [vmem:[#allocation2 + $0x120] sm:$0xff] }
 0x21c   : > { %v2184_v27 = vmax.f32 %v2152_v14, 0.0  ;;  %v1922_v23 = vadd.f32 %v1830_v55, %v1763_v19  ;;  %v1989_v30 = vpop.f32.mrf.mxu0 }
 0x21e   : > { %2217 = vst.msk [vmem:[%s3879_s22 + $0x8] sm:$0xff] %vm2215_vm5, %v2184_v27  ;;  %v2081_v21 = vadd.f32 %v1989_v30, %v1922_v23  ;;  %2536 = vmatmul.msk.f32.gmra.mxu2 %vm230_vm1, %v3839_v18  ;;  %v1382_v11 = vpop.f32.mrf.mxu1  ;;  %v4364_v27 = vld [vmem:[#allocation39_spill] sm:$0xff] }
 0x21f   : > { %2603 = vmatmul.msk.f32.gmra.mxu0 %vm230_vm1, %v3898_v3  ;;  %v1310_v23 = vadd.f32 %v4364_v27, %v4363_v33 }
 0x220   : > { %v2117_v1 = vmul.f32 %v3852_v37, %v2081_v21  ;;  %2570 = vmatmul.msk.f32.gmra.mxu3 %vm230_vm1, %v3882_v20  ;;  %v1559_v21 = vrot.slane %v2649_v16, 2 }
 0x221   : > { %v1674_v17 = vpop.f32.mrf.mxu2  ;;  %2503 = vmatmul.msk.f32.gmra.mxu1 %vm230_vm1, %v3458_v52  ;;  %v1470_v30 = vadd.f32 %v1382_v11, %v1310_v23 }
 0x222   : > { %v2153_v10 = vadd.f32 %v3862_v0, %v2117_v1  ;;  %v1764_v18 = vadd.f32 %v1674_v17, %v1469_v29  ;;  %v2650_v29 = vld [vmem:[#allocation2 + $0x128] sm:$0xff] }
 0x223   : > { %v1833_v45 = vpop.f32.mrf.mxu3  ;;  %v1560_v1 = vrot.slane %v2650_v29, 2 }
 0x224   : > { %v2185_v14 = vmax.f32 %v2153_v10, 0.0  ;;  %v1923_v19 = vadd.f32 %v1833_v45, %v1764_v18  ;;  %v1992_v55 = vpop.f32.mrf.mxu0 }
 0x226   : > { %2218 = vst.msk [vmem:[%s3879_s22 + $0x10] sm:$0xff] %vm2215_vm5, %v2185_v14  ;;  %v2082_v13 = vadd.f32 %v1992_v55, %v1923_v19  ;;  %2537 = vmatmul.msk.f32.gmra.mxu2 %vm230_vm1, %v3855_v53  ;;  %v1385_v52 = vpop.f32.mrf.mxu1  ;;  %v3933_v14 = vsel %vm1498_vm4, %v1559_v21, %v1560_v1  ;;  %v4365_v19 = vld [vmem:[#allocation40_spill] sm:$0xff] }
 0x227   : > { %2604 = vmatmul.msk.f32.gmra.mxu0 %vm230_vm1, %v3916_v41  ;;  %v1311_v55 = vadd.f32 %v4365_v19, %v3435_v42 }
 0x228   : > { %v2118_v32 = vmul.f32 %v3852_v37, %v2082_v13  ;;  %2571 = vmatmul.msk.f32.gmra.mxu3 %vm230_vm1, %v3898_v3  ;;  %v1562_v13 = vrot.slane %v3460_v40, 2 }
 0x229   : > { %v1677_v57 = vpop.f32.mrf.mxu2  ;;  %2504 = vmatmul.msk.f32.gmra.mxu1 %vm230_vm1, %v3477_v34  ;;  %v1471_v27 = vadd.f32 %v1385_v52, %v1311_v55 }
 0x22a   : > { %v2154_v53 = vadd.f32 %v3862_v0, %v2118_v32  ;;  %v1765_v17 = vadd.f32 %v1677_v57, %v1470_v30  ;;  %v3951_v52 = vsel %vm1498_vm4, %v1560_v1, %v1562_v13  ;;  %v4366_v57 = vld [vmem:[#allocation41_spill] sm:$0xff]  ;;  %v2651_v1 = vld [vmem:[#allocation2 + $0x138] sm:$0xff] }
 0x22b   : > { %v1836_v10 = vpop.f32.mrf.mxu3 }
 0x22c   : > { %v2186_v18 = vmax.f32 %v2154_v53, 0.0  ;;  %v1924_v11 = vadd.f32 %v1836_v10, %v1765_v17  ;;  %v1995_v45 = vpop.f32.mrf.mxu0  ;;  %v4367_v53 = vld [vmem:[#allocation42_spill] sm:$0xff] }
 0x22d   : > { %v1312_v17 = vadd.f32 %v4367_v53, %v4366_v57 }
 0x22e   : > { %2219 = vst.msk [vmem:[%s3879_s22 + $0x18] sm:$0xff] %vm2215_vm5, %v2186_v18  ;;  %v2083_v33 = vadd.f32 %v1995_v45, %v1924_v11  ;;  %2538 = vmatmul.msk.f32.gmra.mxu2 %vm230_vm1, %v3882_v20  ;;  %v1388_v34 = vpop.f32.mrf.mxu1  ;;  %v1564_v11 = vrot.slane %v2651_v1, 2  ;;  %v2652_v45 = vld [vmem:[#allocation2 + $0x140] sm:$0xff] }
 0x22f   : > { %2605 = vmatmul.msk.f32.gmra.mxu0 %vm230_vm1, %v3933_v14  ;;  %v1472_v10 = vadd.f32 %v1388_v34, %v1312_v17  ;;  %v1565_v19 = vrot.slane %v2652_v45, 2  ;;  %v4370_v1 = vld [vmem:[#allocation45_spill] sm:$0xff] }
 0x230   : > { %v2119_v23 = vmul.f32 %v3852_v37, %v2083_v33  ;;  %2572 = vmatmul.msk.f32.gmra.mxu3 %vm230_vm1, %v3916_v41 }
 0x231   : > { %v1680_v42 = vpop.f32.mrf.mxu2  ;;  %2505 = vmatmul.msk.f32.gmra.mxu1 %vm230_vm1, %v3495_v6 }
 0x232   : > { %v2155_v30 = vadd.f32 %v3862_v0, %v2119_v23  ;;  %v1766_v20 = vadd.f32 %v1680_v42, %v1471_v27  ;;  %v3968_v42 = vsel %vm1498_vm4, %v1564_v11, %v1565_v19 }
 0x233   : > { %v1839_v32 = vpop.f32.mrf.mxu3 }
 0x234   : > { %v2187_v16 = vmax.f32 %v2155_v30, 0.0  ;;  %v1925_v21 = vadd.f32 %v1839_v32, %v1766_v20  ;;  %v1998_v29 = vpop.f32.mrf.mxu0  ;;  %v4368_v30 = vld [vmem:[#allocation43_spill] sm:$0xff] }
 0x235   : > { %v1313_v20 = vadd.f32 %v4368_v30, %v3472_v59 }
 0x236   : > { %2220 = vst.msk [vmem:[%s3879_s22 + $0x20] sm:$0xff] %vm2215_vm5, %v2187_v16  ;;  %v2084_v40 = vadd.f32 %v1998_v29, %v1925_v21  ;;  %2539 = vmatmul.msk.f32.gmra.mxu2 %vm230_vm1, %v3898_v3  ;;  %v1391_v6 = vpop.f32.mrf.mxu1  ;;  %v1567_v29 = vrot.slane %v3497_v58, 2 }
 0x237   : > { %2606 = vmatmul.msk.f32.gmra.mxu0 %vm230_vm1, %v3951_v52  ;;  %v1473_v16 = vadd.f32 %v1391_v6, %v1313_v20 }
 0x238   : > { %v2120_v18 = vmul.f32 %v3852_v37, %v2084_v40  ;;  %2573 = vmatmul.msk.f32.gmra.mxu3 %vm230_vm1, %v3933_v14  ;;  %v3986_v6 = vsel %vm1498_vm4, %v1565_v19, %v1567_v29  ;;  %v2653_v19 = vld [vmem:[#allocation2 + $0x150] sm:$0xff] }
 0x239   : > { %v1683_v55 = vpop.f32.mrf.mxu2  ;;  %2506 = vmatmul.msk.f32.gmra.mxu1 %vm230_vm1, %v3514_v54 }
 0x23a   : > { %v2156_v3 = vadd.f32 %v3862_v0, %v2120_v18  ;;  %v1767_v33 = vadd.f32 %v1683_v55, %v1472_v10  ;;  %v4369_v18 = vld [vmem:[#allocation44_spill] sm:$0xff] }
 0x23b   : > { %v1842_v27 = vpop.f32.mrf.mxu3  ;;  %v1314_v11 = vadd.f32 %v4370_v1, %v4369_v18 }
 0x23c   : > { %v2188_v23 = vmax.f32 %v2156_v3, 0.0  ;;  %v1926_v34 = vadd.f32 %v1842_v27, %v1767_v33  ;;  %v2001_v13 = vpop.f32.mrf.mxu0  ;;  %v1569_v3 = vrot.slane %v2653_v19, 2  ;;  %v2654_v33 = vld [vmem:[#allocation2 + $0x158] sm:$0xff]  ;;  %v4374_v19 = vld [vmem:[#allocation49_spill] sm:$0xff] }
 0x23d   : > { %v1570_v27 = vrot.slane %v2654_v33, 2 }
 0x23e   : > { %2221 = vst.msk [vmem:[%s3879_s22 + $0x28] sm:$0xff] %vm2215_vm5, %v2188_v23  ;;  %v2085_v32 = vadd.f32 %v2001_v13, %v1926_v34  ;;  %2540 = vmatmul.msk.f32.gmra.mxu2 %vm230_vm1, %v3916_v41  ;;  %v1394_v54 = vpop.f32.mrf.mxu1 }
 0x23f   : > { %2607 = vmatmul.msk.f32.gmra.mxu0 %vm230_vm1, %v3968_v42  ;;  %v1474_v45 = vadd.f32 %v1394_v54, %v1314_v11  ;;  %v4003_v54 = vsel %vm1498_vm4, %v1569_v3, %v1570_v27 }
 0x240   : > { %v2121_v21 = vmul.f32 %v3852_v37, %v2085_v32  ;;  %2574 = vmatmul.msk.f32.gmra.mxu3 %vm230_vm1, %v3951_v52 }
 0x241   : > { %v1686_v59 = vpop.f32.mrf.mxu2  ;;  %2507 = vmatmul.msk.f32.gmra.mxu1 %vm230_vm1, %v3532_v24 }
 0x242   : > { %v2157_v57 = vadd.f32 %v3862_v0, %v2121_v21  ;;  %v1768_v41 = vadd.f32 %v1686_v59, %v1473_v16  ;;  %v4371_v16 = vld [vmem:[#allocation46_spill] sm:$0xff]  ;;  %v4372_v21 = vld [vmem:[#allocation47_spill] sm:$0xff] }
 0x243   : > { %v1845_v53 = vpop.f32.mrf.mxu3  ;;  %v1315_v29 = vadd.f32 %v4372_v21, %v4371_v16  ;;  %v1952_v16 = vrot.slane %v3590_v51, 2  ;;  %v1953_v21 = vrot.slane %v3610_v7, 2 }
 0x244   : > { %v2189_v17 = vmax.f32 %v2157_v57, 0.0  ;;  %v1927_v40 = vadd.f32 %v1845_v53, %v1768_v41  ;;  %v2004_v10 = vpop.f32.mrf.mxu0  ;;  %v1572_v53 = vrot.slane %v3534_v31, 2 }
 0x246   : > { %2222 = vst.msk [vmem:[%s3879_s22 + $0x30] sm:$0xff] %vm2215_vm5, %v2189_v17  ;;  %v2086_v58 = vadd.f32 %v2004_v10, %v1927_v40  ;;  %2541 = vmatmul.msk.f32.gmra.mxu2 %vm230_vm1, %v3933_v14  ;;  %v1397_v24 = vpop.f32.mrf.mxu1  ;;  %v1339_v17 = vrot.slane %v3590_v51, 1  ;;  %v1340_v40 = vrot.slane %v3610_v7, 1  ;;  %v4060_v51 = vsel %vm1498_vm4, %v1952_v16, %v1953_v21 }
 0x247   : > { %2608 = vmatmul.msk.f32.gmra.mxu0 %vm230_vm1, %v3986_v6  ;;  %v1475_v57 = vadd.f32 %v1397_v24, %v1315_v29 }
 0x248   : > { %v2122_v55 = vmul.f32 %v3852_v37, %v2086_v58  ;;  %2575 = vmatmul.msk.f32.gmra.mxu3 %vm230_vm1, %v3968_v42  ;;  %v4028_v31 = vsel %vm883_vm3, %v1339_v17, %v1340_v40 }
 0x249   : > { %v1689_v23 = vpop.f32.mrf.mxu2  ;;  %2508 = vmatmul.msk.f32.gmra.mxu1 %vm230_vm1, %v3553_v47 }
 0x24a   : > { %v2158_v14 = vadd.f32 %v3862_v0, %v2122_v55  ;;  %v1769_v34 = vadd.f32 %v1689_v23, %v1474_v45  ;;  %v4023_v45 = vsel %vm1498_vm4, %v1570_v27, %v1572_v53  ;;  %v4373_v55 = vld [vmem:[#allocation48_spill] sm:$0xff]  ;;  %v4375_v53 = vld [vmem:[#allocation50_spill] sm:$0xff] }
 0x24b   : > { %v1848_v13 = vpop.f32.mrf.mxu3  ;;  %v1316_v3 = vadd.f32 %v4374_v19, %v4373_v55  ;;  %v1317_v17 = vadd.f32 %v4375_v53, %v3548_v2  ;;  %v1577_v2 = vrot.slane %v3578_v39, 2  ;;  %v4378_v53 = vld [vmem:[#allocation53_spill] sm:$0xff] }
 0x24c   : > { %v2190_v30 = vmax.f32 %v2158_v14, 0.0  ;;  %v1928_v20 = vadd.f32 %v1848_v13, %v1769_v34  ;;  %v2007_v32 = vpop.f32.mrf.mxu0  ;;  %v2655_v14 = vld [vmem:[#allocation2 + $0x168] sm:$0xff]  ;;  %v2656_v13 = vld [vmem:[#allocation2 + $0x170] sm:$0xff] }
 0x24d   : > { %v1574_v34 = vrot.slane %v2655_v14, 2 }
 0x24e   : > { %2223 = vst.msk [vmem:[%s3879_s22 + $0x38] sm:$0xff] %vm2215_vm5, %v2190_v30  ;;  %v2087_v59 = vadd.f32 %v2007_v32, %v1928_v20  ;;  %2542 = vmatmul.msk.f32.gmra.mxu2 %vm230_vm1, %v3951_v52  ;;  %v1400_v47 = vpop.f32.mrf.mxu1  ;;  %v1575_v30 = vrot.slane %v2656_v13, 2 }
 0x24f   : > { %2609 = vmatmul.msk.f32.gmra.mxu0 %vm230_vm1, %v4003_v54  ;;  %v1476_v27 = vadd.f32 %v1400_v47, %v1316_v3 }
 0x250   : > { %v2123_v41 = vmul.f32 %v3852_v37, %v2087_v59  ;;  %2576 = vmatmul.msk.f32.gmra.mxu3 %vm230_vm1, %v3986_v6  ;;  %v4070_v3 = vsel %vm1498_vm4, %v1575_v30, %v1577_v2  ;;  %v1796_v2 = vrot.slane %v3619_v9, 2 }
 0x251   : > { %v1692_v10 = vpop.f32.mrf.mxu2  ;;  %2509 = vmatmul.msk.f32.gmra.mxu1 %vm230_vm1, %v3576_v12 }
 0x252   : > { %v2159_v52 = vadd.f32 %v3862_v0, %v2123_v41  ;;  %v1770_v18 = vadd.f32 %v1692_v10, %v1475_v57  ;;  %v4047_v41 = vsel %vm1498_vm4, %v1574_v34, %v1575_v30  ;;  %v2658_v34 = vld [vmem:[#allocation2 + $0x188] sm:$0xff] }
 0x253   : > { %v1851_v1 = vpop.f32.mrf.mxu3  ;;  %v1794_v13 = vrot.slane %v2658_v34, 2 }
 0x254   : > { %v2191_v11 = vmax.f32 %v2159_v52, 0.0  ;;  %v1929_v58 = vadd.f32 %v1851_v1, %v1770_v18  ;;  %v2010_v24 = vpop.f32.mrf.mxu0 }
 0x256   : > { %2224 = vst.msk [vmem:[%s3879_s22 + $0x40] sm:$0xff] %vm2215_vm5, %v2191_v11  ;;  %v2088_v12 = vadd.f32 %v2010_v24, %v1929_v58  ;;  %2543 = vmatmul.msk.f32.gmra.mxu2 %vm230_vm1, %v3968_v42  ;;  %v1403_v33 = vpop.f32.mrf.mxu1 }
 0x257   : > { %2610 = vmatmul.msk.f32.gmra.mxu0 %vm230_vm1, %v4023_v45  ;;  %v1477_v52 = vadd.f32 %v1403_v33, %v1317_v17  ;;  %v4377_v33 = vld [vmem:[#allocation52_spill] sm:$0xff]  ;;  %v1319_v17 = vadd.f32 %v4378_v53, %v3592_v15 }
 0x258   : > { %v2124_v23 = vmul.f32 %v3852_v37, %v2088_v12  ;;  %2577 = vmatmul.msk.f32.gmra.mxu3 %vm230_vm1, %v4003_v54  ;;  %v4376_v12 = vld [vmem:[#allocation51_spill] sm:$0xff] }
 0x259   : > { %v1695_v20 = vpop.f32.mrf.mxu2  ;;  %2510 = vmatmul.msk.f32.gmra.mxu1 %vm230_vm1, %v3597_v22 }
 0x25a   : > { %v2160_v42 = vadd.f32 %v3862_v0, %v2124_v23  ;;  %v1771_v32 = vadd.f32 %v1695_v20, %v1476_v27  ;;  %v1318_v27 = vadd.f32 %v4377_v33, %v4376_v12  ;;  %v2657_v23 = vld [vmem:[#allocation2 + $0x180] sm:$0xff]  ;;  %v4379_v12 = vld [vmem:[#allocation54_spill] sm:$0xff]  ;;  %v4380_v33 = vld [vmem:[#allocation55_spill] sm:$0xff] }
 0x25b   : > { %v1854_v29 = vpop.f32.mrf.mxu3  ;;  %v1793_v14 = vrot.slane %v2657_v23, 2 }
 0x25c   : > { %v2192_v59 = vmax.f32 %v2160_v42, 0.0  ;;  %v1930_v47 = vadd.f32 %v1854_v29, %v1771_v32  ;;  %v2013_v57 = vpop.f32.mrf.mxu0 }
 0x25e   : > { %2225 = vst.msk [vmem:[%s3879_s22 + $0x48] sm:$0xff] %vm2215_vm5, %v2192_v59  ;;  %v2089_v22 = vadd.f32 %v2013_v57, %v1930_v47  ;;  %2544 = vmatmul.msk.f32.gmra.mxu2 %vm230_vm1, %v3986_v6  ;;  %v1406_v10 = vpop.f32.mrf.mxu1  ;;  %v1795_v57 = vsel %vm1498_vm4, %v1793_v14, %v1794_v13 }
 0x25f   : > { %2611 = vmatmul.msk.f32.gmra.mxu0 %vm230_vm1, %v4047_v41  ;;  %v1478_v30 = vadd.f32 %v1406_v10, %v1318_v27  ;;  %v1320_v27 = vadd.f32 %v4380_v33, %v4379_v12 }
 0x260   : > { %v2125_v18 = vmul.f32 %v3852_v37, %v2089_v22  ;;  %2578 = vmatmul.msk.f32.gmra.mxu3 %vm230_vm1, %v4023_v45 }
 0x261   : > { %v1698_v1 = vpop.f32.mrf.mxu2  ;;  %2511 = vmatmul.msk.f32.gmra.mxu1 %vm230_vm1, %v3617_v5 }
 0x262   : > { %v2161_v6 = vadd.f32 %v3862_v0, %v2125_v18  ;;  %v1772_v11 = vadd.f32 %v1698_v1, %v1477_v52 }
 0x263   : > { %v1857_v58 = vpop.f32.mrf.mxu3 }
 0x264   : > { %v2193_v24 = vmax.f32 %v2161_v6, 0.0  ;;  %v1931_v55 = vadd.f32 %v1857_v58, %v1772_v11  ;;  %v2016_v19 = vpop.f32.mrf.mxu0 }
 0x266   : > { %2226 = vst.msk [vmem:[%s3879_s22 + $0x50] sm:$0xff] %vm2215_vm5, %v2193_v24  ;;  %v2090_v39 = vadd.f32 %v2016_v19, %v1931_v55  ;;  %2545 = vmatmul.msk.f32.gmra.mxu2 %vm230_vm1, %v4003_v54  ;;  %v1409_v5 = vpop.f32.mrf.mxu1  ;;  %v1797_v19 = vsel %vm1498_vm4, %v1794_v13, %v1796_v2 }
 0x267   : > { %2612 = vmatmul.msk.f32.gmra.mxu0 %vm230_vm1, %v4070_v3  ;;  %v1479_v52 = vadd.f32 %v1409_v5, %v1319_v17 }
 0x268   : > { %v2126_v20 = vmul.f32 %v3852_v37, %v2090_v39  ;;  %2579 = vmatmul.msk.f32.gmra.mxu3 %vm230_vm1, %v4047_v41 }
 0x269   : > { %v1701_v42 = vpop.f32.mrf.mxu2  ;;  %2512 = vmatmul.msk.f32.gmra.mxu1 %vm230_vm1, %v3638_v8  ;;  %v372_v8 = vld [vmem:[#allocation2 + $0x1a8] sm:$0x3] }
 0x26a   : > { %v2162_v54 = vadd.f32 %v3862_v0, %v2126_v20  ;;  %v1773_v32 = vadd.f32 %v1701_v42, %v1478_v30  ;;  %v1342_v6 = vrot.slane %v372_v8, 1 }
 0x26b   : > { %v1860_v16 = vpop.f32.mrf.mxu3 }
 0x26c   : > { %v2194_v29 = vmax.f32 %v2162_v54, 0.0  ;;  %v1932_v59 = vadd.f32 %v1860_v16, %v1773_v32  ;;  %v2019_v47 = vpop.f32.mrf.mxu0  ;;  %v1343_v39 = vsel %vm883_vm3, %v1340_v40, %v1342_v6  ;;  %v1321_v40 = vadd.f32 %v3635_v60, %v3633_v61 }
 0x26e   : > { %2227 = vst.msk [vmem:[%s3879_s22 + $0x58] sm:$0xff] %vm2215_vm5, %v2194_v29  ;;  %v2091_v22 = vadd.f32 %v2019_v47, %v1932_v59  ;;  %2546 = vmatmul.msk.f32.gmra.mxu2 %vm230_vm1, %v4023_v45  ;;  %v1412_v10 = vpop.f32.mrf.mxu1  ;;  %v1955_v59 = vrot.slane %v372_v8, 2 }
 0x26f   : > { %2613 = vmatmul.msk.f32.gmra.mxu0 %vm230_vm1, %v1795_v57  ;;  %v1480_v5 = vadd.f32 %v1412_v10, %v1320_v27 }
 0x270   : > { %v2127_v18 = vmul.f32 %v3852_v37, %v2091_v22  ;;  %2580 = vmatmul.msk.f32.gmra.mxu3 %vm230_vm1, %v4070_v3 }
 0x271   : > { %v1704_v15 = vpop.f32.mrf.mxu2  ;;  %2513 = vmatmul.msk.f32.gmra.mxu1 %vm230_vm1, %v4028_v31 }
 0x272   : > { %v2163_v1 = vadd.f32 %v3862_v0, %v2127_v18  ;;  %v1774_v45 = vadd.f32 %v1704_v15, %v1479_v52 }
 0x273   : > { %v1863_v11 = vpop.f32.mrf.mxu3 }
 0x274   : > { %v2195_v58 = vmax.f32 %v2163_v1, 0.0  ;;  %v1933_v24 = vadd.f32 %v1863_v11, %v1774_v45  ;;  %v2022_v55 = vpop.f32.mrf.mxu0 }
 0x276   : > { %2228 = vst.msk [vmem:[%s3879_s22 + $0x60] sm:$0xff] %vm2215_vm5, %v2195_v58  ;;  %v2092_v9 = vadd.f32 %v2022_v55, %v1933_v24  ;;  %2547 = vmatmul.msk.f32.gmra.mxu2 %vm230_vm1, %v4047_v41  ;;  %v1415_v31 = vpop.f32.mrf.mxu1 }
 0x277   : > { %2614 = vmatmul.msk.f32.gmra.mxu0 %vm230_vm1, %v1797_v19  ;;  %v1481_v16 = vadd.f32 %v1415_v31, %v1321_v40  ;;  %v1325_v40 = vadd.f32 %v3696_v28, %v3694_v36 }
 0x278   : > { %v2128_v23 = vmul.f32 %v3852_v37, %v2092_v9  ;;  %2581 = vmatmul.msk.f32.gmra.mxu3 %vm230_vm1, %v1795_v57 }
 0x279   : > { %v1707_v14 = vpop.f32.mrf.mxu2  ;;  %2514 = vmatmul.msk.f32.gmra.mxu1 %vm230_vm1, %v1343_v39  ;;  %v1324_v39 = vadd.f32 %v3684_v25, %v3682_v63 }
 0x27a   : > { %v2164_v34 = vadd.f32 %v3862_v0, %v2128_v23  ;;  %v1775_v13 = vadd.f32 %v1707_v14, %v1480_v5 }
 0x27b   : > { %v1866_v41 = vpop.f32.mrf.mxu3 }
 0x27c   : > { %v2196_v30 = vmax.f32 %v2164_v34, 0.0  ;;  %v1934_v20 = vadd.f32 %v1866_v41, %v1775_v13  ;;  %v2025_v42 = vpop.f32.mrf.mxu0 }
 0x27e   : > { %2229 = vst.msk [vmem:[%s3879_s22 + $0x68] sm:$0xff] %vm2215_vm5, %v2196_v30  ;;  %v2093_v54 = vadd.f32 %v2025_v42, %v1934_v20  ;;  %2548 = vmatmul.msk.f32.gmra.mxu2 %vm230_vm1, %v4070_v3  ;;  %v1418_v32 = vpop.f32.mrf.mxu1  ;;  %v1956_v3 = vsel %vm1498_vm4, %v1953_v21, %v1955_v59 }
 0x27f   : > { %2615 = vmatmul.msk.f32.gmra.mxu0 %vm230_vm1, %v4060_v51  ;;  %v1322_v51 = vadd.f32 %v3658_v48, %v3656_v38  ;;  %v1323_v38 = vadd.f32 %v3671_v56, %v3669_v35 }
 0x280   : > { %v2129_v29 = vmul.f32 %v3852_v37, %v2093_v54  ;;  %2582 = vmatmul.msk.f32.gmra.mxu3 %vm230_vm1, %v1797_v19 }
 0x281   : > { %v1710_v47 = vpop.f32.mrf.mxu2  ;;  %v1482_v52 = vadd.f32 %v1418_v32, %v1322_v51 }
 0x282   : > { %v2165_v61 = vadd.f32 %v3862_v0, %v2129_v29  ;;  %v1776_v60 = vadd.f32 %v1710_v47, %v1481_v16 }
 0x283   : > { %v1869_v57 = vpop.f32.mrf.mxu3 }
 0x284   : > { %v2197_v53 = vmax.f32 %v2165_v61, 0.0  ;;  %v1935_v17 = vadd.f32 %v1869_v57, %v1776_v60  ;;  %v2028_v22 = vpop.f32.mrf.mxu0 }
 0x286   : > { %2230 = vst.msk [vmem:[%s3879_s22 + $0x70] sm:$0xff] %vm2215_vm5, %v2197_v53  ;;  %v2094_v10 = vadd.f32 %v2028_v22, %v1935_v17  ;;  %v1421_v8 = vpop.f32.mrf.mxu1  ;;  %v4381_v53 = vld [vmem:[#allocation17_spill] sm:$0xff] }
 0x287   : > { %2616 = vmatmul.msk.f32.gmra.mxu0 %vm230_vm1, %v1956_v3  ;;  %v1483_v58 = vadd.f32 %v1421_v8, %v1323_v38  ;;  %v1326_v17 = vadd.f32 %v4381_v53, %v3707_v44  ;;  %v4388_v53 = vld [vmem:[#allocation24_spill] sm:$0xff] }
 0x288   : > { %v2130_v18 = vmul.f32 %v3852_v37, %v2094_v10 }
 0x289   : > { %v1713_v2 = vpop.f32.mrf.mxu2 }
 0x28a   : > { %v2166_v15 = vadd.f32 %v3862_v0, %v2130_v18  ;;  %v1777_v1 = vadd.f32 %v1713_v2, %v1482_v52 }
 0x28b   : > { %v1872_v7 = vpop.f32.mrf.mxu3 }
 0x28c   : > { %v2198_v45 = vmax.f32 %v2166_v15, 0.0  ;;  %v1936_v21 = vadd.f32 %v1872_v7, %v1777_v1  ;;  %v2031_v6 = vpop.f32.mrf.mxu0  ;;  %v4382_v1 = vld [vmem:[#allocation5_spill] sm:$0xff]  ;;  %v4383_v7 = vld [vmem:[#allocation6_spill] sm:$0xff] }
 0x28e   : > { %2231 = vst.msk [vmem:[%s3879_s22 + $0x78] sm:$0xff] %vm2215_vm5, %v2198_v45  ;;  %v2095_v48 = vadd.f32 %v2031_v6, %v1936_v21  ;;  %v1424_v11 = vpop.f32.mrf.mxu1  ;;  %v1327_v45 = vadd.f32 %v4383_v7, %v4382_v1  ;;  %v4390_v7 = vld [vmem:[#allocation10_spill] sm:$0xff] }
 0x28f   : > { %v1484_v5 = vadd.f32 %v1424_v11, %v1324_v39 }
 0x290   : > { %v2131_v24 = vmul.f32 %v3852_v37, %v2095_v48 }
 0x291   : > { %v1716_v55 = vpop.f32.mrf.mxu2 }
 0x292   : > { %v2167_v19 = vadd.f32 %v3862_v0, %v2131_v24  ;;  %v1778_v12 = vadd.f32 %v1716_v55, %v1483_v58 }
 0x293   : > { %v1875_v33 = vpop.f32.mrf.mxu3 }
 0x294   : > { %v2199_v27 = vmax.f32 %v2167_v19, 0.0  ;;  %v1937_v9 = vadd.f32 %v1875_v33, %v1778_v12  ;;  %v2034_v31 = vpop.f32.mrf.mxu0  ;;  %v4384_v33 = vld [vmem:[#allocation20_spill] sm:$0xff] }
 0x296   : > { %2232 = vst.msk [vmem:[%s3879_s22 + $0x80] sm:$0xff] %vm2215_vm5, %v2199_v27  ;;  %v2096_v35 = vadd.f32 %v2034_v31, %v1937_v9  ;;  %v1427_v56 = vpop.f32.mrf.mxu1  ;;  %v4385_v27 = vld [vmem:[#allocation3_spill] sm:$0xff] }
 0x297   : > { %v1485_v54 = vadd.f32 %v1427_v56, %v1325_v40  ;;  %v1328_v9 = vadd.f32 %v4385_v27, %v4384_v33  ;;  %v4392_v27 = vld [vmem:[#allocation13_spill] sm:$0xff] }
 0x298   : > { %v2132_v23 = vmul.f32 %v3852_v37, %v2096_v35 }
 0x299   : > { %v1719_v14 = vpop.f32.mrf.mxu2 }
 0x29a   : > { %v2168_v34 = vadd.f32 %v3862_v0, %v2132_v23  ;;  %v1779_v13 = vadd.f32 %v1719_v14, %v1484_v5 }
 0x29b   : > { %v1878_v41 = vpop.f32.mrf.mxu3 }
 0x29c   : > { %v2200_v30 = vmax.f32 %v2168_v34, 0.0  ;;  %v1938_v20 = vadd.f32 %v1878_v41, %v1779_v13  ;;  %v2037_v42 = vpop.f32.mrf.mxu0 }
 0x29e   : > { %2233 = vst.msk [vmem:[%s3879_s22 + $0x88] sm:$0xff] %vm2215_vm5, %v2200_v30  ;;  %v2097_v63 = vadd.f32 %v2037_v42, %v1938_v20  ;;  %v1430_v25 = vpop.f32.mrf.mxu1  ;;  %v4386_v20 = vld [vmem:[#allocation4_spill] sm:$0xff] }
 0x29f   : > { %v1486_v22 = vadd.f32 %v1430_v25, %v1326_v17  ;;  %v4387_v42 = vld [vmem:[#allocation8_spill] sm:$0xff]  ;;  %v4389_v17 = vld [vmem:[#allocation7_spill] sm:$0xff] }
 0x2a0   : > { %v2133_v32 = vmul.f32 %v3852_v37, %v2097_v63  ;;  %v1329_v40 = vadd.f32 %v4387_v42, %v4386_v20  ;;  %v4393_v20 = vld [vmem:[#allocation30_spill] sm:$0xff] }
 0x2a1   : > { %v1722_v16 = vpop.f32.mrf.mxu2  ;;  %v1333_v42 = vadd.f32 %v4393_v20, %v3788_v43 }
 0x2a2   : > { %v2169_v29 = vadd.f32 %v3862_v0, %v2133_v32  ;;  %v1780_v59 = vadd.f32 %v1722_v16, %v1485_v54 }
 0x2a3   : > { %v1881_v47 = vpop.f32.mrf.mxu3 }
 0x2a4   : > { %v2201_v61 = vmax.f32 %v2169_v29, 0.0  ;;  %v1939_v60 = vadd.f32 %v1881_v47, %v1780_v59  ;;  %v2040_v57 = vpop.f32.mrf.mxu0 }
 0x2a6   : > { %2234 = vst.msk [vmem:[%s3879_s22 + $0x90] sm:$0xff] %vm2215_vm5, %v2201_v61  ;;  %v2098_v36 = vadd.f32 %v2040_v57, %v1939_v60  ;;  %v1433_v28 = vpop.f32.mrf.mxu1 }
 0x2a7   : > { %v1487_v6 = vadd.f32 %v1433_v28, %v1327_v45  ;;  %v4391_v45 = vld [vmem:[#allocation27_spill] sm:$0xff] }
 0x2a8   : > { %v2134_v3 = vmul.f32 %v3852_v37, %v2098_v36  ;;  %v1330_v36 = vadd.f32 %v4389_v17, %v4388_v53 }
 0x2a9   : > { %v1725_v51 = vpop.f32.mrf.mxu2 }
 0x2aa   : > { %v2170_v10 = vadd.f32 %v3862_v0, %v2134_v3  ;;  %v1781_v8 = vadd.f32 %v1725_v51, %v1486_v22 }
 0x2ab   : > { %v1884_v52 = vpop.f32.mrf.mxu3 }
 0x2ac   : > { %v2202_v18 = vmax.f32 %v2170_v10, 0.0  ;;  %v1940_v2 = vadd.f32 %v1884_v52, %v1781_v8  ;;  %v2043_v15 = vpop.f32.mrf.mxu0 }
 0x2ae   : > { %2235 = vst.msk [vmem:[%s3879_s22 + $0x98] sm:$0xff] %vm2215_vm5, %v2202_v18  ;;  %v2099_v44 = vadd.f32 %v2043_v15, %v1940_v2  ;;  %v1436_v21 = vpop.f32.mrf.mxu1 }
 0x2af   : > { %v1488_v35 = vadd.f32 %v1436_v21, %v1328_v9  ;;  %v1332_v9 = vadd.f32 %v4392_v27, %v3776_v4 }
 0x2b0   : > { %v2135_v38 = vmul.f32 %v3852_v37, %v2099_v44  ;;  %v1331_v44 = vadd.f32 %v4391_v45, %v4390_v7 }
 0x2b1   : > { %v1728_v48 = vpop.f32.mrf.mxu2 }
 0x2b2   : > { %v2171_v11 = vadd.f32 %v3862_v0, %v2135_v38  ;;  %v1782_v58 = vadd.f32 %v1728_v48, %v1487_v6 }
 0x2b3   : > { %v1887_v24 = vpop.f32.mrf.mxu3 }
 0x2b4   : > { %v2203_v55 = vmax.f32 %v2171_v11, 0.0  ;;  %v1941_v19 = vadd.f32 %v1887_v24, %v1782_v58  ;;  %v2046_v12 = vpop.f32.mrf.mxu0 }
 0x2b6   : > { %2236 = vst.msk [vmem:[%s3879_s22 + $0xa0] sm:$0xff] %vm2215_vm5, %v2203_v55  ;;  %v2100_v31 = vadd.f32 %v2046_v12, %v1941_v19  ;;  %v1439_v39 = vpop.f32.mrf.mxu1 }
 0x2b7   : > { %v1489_v54 = vadd.f32 %v1439_v39, %v1329_v40 }
 0x2b8   : > { %v2136_v56 = vmul.f32 %v3852_v37, %v2100_v31 }
 0x2b9   : > { %v1731_v5 = vpop.f32.mrf.mxu2 }
 0x2ba   : > { %v2172_v23 = vadd.f32 %v3862_v0, %v2136_v56  ;;  %v1783_v14 = vadd.f32 %v1731_v5, %v1488_v35 }
 0x2bb   : > { %v1890_v34 = vpop.f32.mrf.mxu3 }
 0x2bc   : > { %v2204_v13 = vmax.f32 %v2172_v23, 0.0  ;;  %v1942_v41 = vadd.f32 %v1890_v34, %v1783_v14  ;;  %v2049_v30 = vpop.f32.mrf.mxu0 }
 0x2be   : > { %2237 = vst.msk [vmem:[%s3879_s22 + $0xa8] sm:$0xff] %vm2215_vm5, %v2204_v13  ;;  %v2101_v63 = vadd.f32 %v2049_v30, %v1942_v41  ;;  %v1442_v25 = vpop.f32.mrf.mxu1 }
 0x2bf   : > { %v1490_v3 = vadd.f32 %v1442_v25, %v1330_v36 }
 0x2c0   : > { %v2137_v32 = vmul.f32 %v3852_v37, %v2101_v63 }
 0x2c1   : > { %v1734_v16 = vpop.f32.mrf.mxu2 }
 0x2c2   : > { %v2173_v29 = vadd.f32 %v3862_v0, %v2137_v32  ;;  %v1784_v59 = vadd.f32 %v1734_v16, %v1489_v54 }
 0x2c3   : > { %v1893_v47 = vpop.f32.mrf.mxu3 }
 0x2c4   : > { %v2205_v61 = vmax.f32 %v2173_v29, 0.0  ;;  %v1943_v60 = vadd.f32 %v1893_v47, %v1784_v59  ;;  %v2052_v57 = vpop.f32.mrf.mxu0 }
 0x2c6   : > { %2238 = vst.msk [vmem:[%s3879_s22 + $0xb0] sm:$0xff] %vm2215_vm5, %v2205_v61  ;;  %v2102_v28 = vadd.f32 %v2052_v57, %v1943_v60  ;;  %v1445_v22 = vpop.f32.mrf.mxu1  ;;  %v4394_v60 = vld [vmem:[#allocation11_spill] sm:$0xff] }
 0x2c7   : > { %v1491_v38 = vadd.f32 %v1445_v22, %v1331_v44  ;;  %v1334_v57 = vadd.f32 %v4394_v60, %v3799_v50 }
 0x2c8   : > { %v2138_v51 = vmul.f32 %v3852_v37, %v2102_v28 }
 0x2c9   : > { %v1737_v10 = vpop.f32.mrf.mxu2 }
 0x2ca   : > { %v2174_v8 = vadd.f32 %v3862_v0, %v2138_v51  ;;  %v1785_v52 = vadd.f32 %v1737_v10, %v1490_v3 }
 0x2cb   : > { %v1896_v18 = vpop.f32.mrf.mxu3 }
 0x2cc   : > { %v2206_v2 = vmax.f32 %v2174_v8, 0.0  ;;  %v1944_v15 = vadd.f32 %v1896_v18, %v1785_v52  ;;  %v2055_v1 = vpop.f32.mrf.mxu0  ;;  %v1335_v18 = vadd.f32 %v3813_v26, %v3811_v62 }
 0x2ce   : > { %2239 = vst.msk [vmem:[%s3879_s22 + $0xb8] sm:$0xff] %vm2215_vm5, %v2206_v2  ;;  %v2103_v21 = vadd.f32 %v2055_v1, %v1944_v15  ;;  %v1448_v6 = vpop.f32.mrf.mxu1 }
 0x2cf   : > { %v1492_v35 = vadd.f32 %v1448_v6, %v1332_v9 }
 0x2d0   : > { %v2139_v48 = vmul.f32 %v3852_v37, %v2103_v21 }
 0x2d1   : > { %v1740_v11 = vpop.f32.mrf.mxu2 }
 0x2d2   : > { %v2175_v58 = vadd.f32 %v3862_v0, %v2139_v48  ;;  %v1786_v24 = vadd.f32 %v1740_v11, %v1491_v38  ;;  %v4395_v11 = vld [vmem:[#allocation15_spill] sm:$0xff] }
 0x2d3   : > { %v1899_v55 = vpop.f32.mrf.mxu3 }
 0x2d4   : > { %v2207_v19 = vmax.f32 %v2175_v58, 0.0  ;;  %v1945_v12 = vadd.f32 %v1899_v55, %v1786_v24  ;;  %v2058_v33 = vpop.f32.mrf.mxu0  ;;  %v1336_v58 = vadd.f32 %v4395_v11, %v3822_v49 }
 0x2d6   : > { %2240 = vst.msk [vmem:[%s3879_s22 + $0xc0] sm:$0xff] %vm2215_vm5, %v2207_v19  ;;  %v2104_v31 = vadd.f32 %v2058_v33, %v1945_v12  ;;  %v1451_v39 = vpop.f32.mrf.mxu1 }
 0x2d7   : > { %v1493_v63 = vadd.f32 %v1451_v39, %v1333_v42 }
 0x2d8   : > { %v2140_v56 = vmul.f32 %v3852_v37, %v2104_v31 }
 0x2d9   : > { %v1743_v5 = vpop.f32.mrf.mxu2 }
 0x2da   : > { %v2176_v23 = vadd.f32 %v3862_v0, %v2140_v56  ;;  %v1787_v14 = vadd.f32 %v1743_v5, %v1492_v35  ;;  %v4396_v35 = vld [vmem:[#allocation9_spill] sm:$0xff] }
 0x2db   : > { %v1902_v34 = vpop.f32.mrf.mxu3  ;;  %v1337_v56 = vadd.f32 %v4396_v35, %v3834_v46 }
 0x2dc   : > { %v2208_v13 = vmax.f32 %v2176_v23, 0.0  ;;  %v1946_v41 = vadd.f32 %v1902_v34, %v1787_v14  ;;  %v2061_v30 = vpop.f32.mrf.mxu0 }
 0x2de   : > { %2241 = vst.msk [vmem:[%s3879_s22 + $0xc8] sm:$0xff] %vm2215_vm5, %v2208_v13  ;;  %v2105_v4 = vadd.f32 %v2061_v30, %v1946_v41  ;;  %v1454_v40 = vpop.f32.mrf.mxu1 }
 0x2df   : > { %v1494_v53 = vadd.f32 %v1454_v40, %v1334_v57 }
 0x2e0   : > { %v2141_v25 = vmul.f32 %v3852_v37, %v2105_v4 }
 0x2e1   : > { %v1746_v54 = vpop.f32.mrf.mxu2 }
 0x2e2   : > { %v2177_v32 = vadd.f32 %v3862_v0, %v2141_v25  ;;  %v1788_v16 = vadd.f32 %v1746_v54, %v1493_v63 }
 0x2e3   : > { %v1905_v29 = vpop.f32.mrf.mxu3 }
 0x2e4   : > { %v2209_v59 = vmax.f32 %v2177_v32, 0.0  ;;  %v1947_v47 = vadd.f32 %v1905_v29, %v1788_v16  ;;  %v2064_v61 = vpop.f32.mrf.mxu0 }
 0x2e6   : > { %2242 = vst.msk [vmem:[%s3879_s22 + $0xd0] sm:$0xff] %vm2215_vm5, %v2209_v59  ;;  %v2106_v43 = vadd.f32 %v2064_v61, %v1947_v47  ;;  %v1457_v28 = vpop.f32.mrf.mxu1 }
 0x2e7   : > { %v1495_v2 = vadd.f32 %v1457_v28, %v1335_v18 }
 0x2e8   : > { %v2142_v17 = vmul.f32 %v3852_v37, %v2106_v43 }
 0x2e9   : > { %v1749_v36 = vpop.f32.mrf.mxu2 }
 0x2ea   : > { %v2178_v22 = vadd.f32 %v3862_v0, %v2142_v17  ;;  %v1789_v3 = vadd.f32 %v1749_v36, %v1494_v53 }
 0x2eb   : > { %v1908_v51 = vpop.f32.mrf.mxu3 }
 0x2ec   : > { %v2210_v10 = vmax.f32 %v2178_v22, 0.0  ;;  %v1948_v8 = vadd.f32 %v1908_v51, %v1789_v3  ;;  %v2067_v52 = vpop.f32.mrf.mxu0 }
 0x2ee   : > { %2243 = vst.msk [vmem:[%s3879_s22 + $0xd8] sm:$0xff] %vm2215_vm5, %v2210_v10  ;;  %v2107_v50 = vadd.f32 %v2067_v52, %v1948_v8  ;;  %v1460_v44 = vpop.f32.mrf.mxu1 }
 0x2ef   : > { %v1496_v26 = vadd.f32 %v1460_v44, %v1336_v58 }
 0x2f0   : > { %v2143_v15 = vmul.f32 %v3852_v37, %v2107_v50 }
 0x2f1   : > { %v1752_v1 = vpop.f32.mrf.mxu2 }
 0x2f2   : > { %v2179_v7 = vadd.f32 %v3862_v0, %v2143_v15  ;;  %v1790_v45 = vadd.f32 %v1752_v1, %v1495_v2 }
 0x2f3   : > { %v1911_v21 = vpop.f32.mrf.mxu3 }
 0x2f4   : > { %v2211_v6 = vmax.f32 %v2179_v7, 0.0  ;;  %v1949_v38 = vadd.f32 %v1911_v21, %v1790_v45  ;;  %v2070_v48 = vpop.f32.mrf.mxu0 }
 0x2f6   : > { %2244 = vst.msk [vmem:[%s3879_s22 + $0xe0] sm:$0xff] %vm2215_vm5, %v2211_v6  ;;  %v2108_v62 = vadd.f32 %v2070_v48, %v1949_v38  ;;  %v1463_v39 = vpop.f32.mrf.mxu1 }
 0x2f7   : > { %v1497_v5 = vadd.f32 %v1463_v39, %v1337_v56 }
 0x2f8   : > { %v2144_v24 = vmul.f32 %v3852_v37, %v2108_v62 }
 0x2f9   : > { %v1755_v55 = vpop.f32.mrf.mxu2 }
 0x2fa   : > { %v2180_v19 = vadd.f32 %v3862_v0, %v2144_v24  ;;  %v1791_v12 = vadd.f32 %v1755_v55, %v1496_v26 }
 0x2fb   : > { %v1914_v33 = vpop.f32.mrf.mxu3 }
 0x2fc   : > { %v2212_v27 = vmax.f32 %v2180_v19, 0.0  ;;  %v1950_v9 = vadd.f32 %v1914_v33, %v1791_v12  ;;  %v2073_v31 = vpop.f32.mrf.mxu0 }
 0x2fe   : > { %2245 = vst.msk [vmem:[%s3879_s22 + $0xe8] sm:$0xff] %vm2215_vm5, %v2212_v27  ;;  %v2109_v49 = vadd.f32 %v2073_v31, %v1950_v9 }
 0x300   : > { %v2145_v23 = vmul.f32 %v3852_v37, %v2109_v49 }
 0x301   : > { %v1758_v14 = vpop.f32.mrf.mxu2 }
 0x302   : > { %v2181_v34 = vadd.f32 %v3862_v0, %v2145_v23  ;;  %v1792_v13 = vadd.f32 %v1758_v14, %v1497_v5 }
 0x303   : > { %v1917_v41 = vpop.f32.mrf.mxu3 }
 0x304   : > { %v2213_v30 = vmax.f32 %v2181_v34, 0.0  ;;  %v1951_v20 = vadd.f32 %v1917_v41, %v1792_v13  ;;  %v2076_v42 = vpop.f32.mrf.mxu0 }
 0x306   : > { %2246 = vst.msk [vmem:[%s3879_s22 + $0xf0] sm:$0xff] %vm2215_vm5, %v2213_v30  ;;  %v2110_v4 = vadd.f32 %v2076_v42, %v1951_v20 }
 0x308   : > { %v2146_v46 = vmul.f32 %v3852_v37, %v2110_v4 }
 0x30a   : > { %v2182_v40 = vadd.f32 %v3862_v0, %v2146_v46 }
 0x30c   : > { %v2214_v63 = vmax.f32 %v2182_v40, 0.0 }
 0x30e   : > { %2247 = vst.msk [vmem:[%s3879_s22 + $0xf8] sm:$0xff] %vm2215_vm5, %v2214_v63 }
 0x30f PF: > { %s14_s15 = sadd.s32 1, %s2665_s15  }
 0x310   : > { %p11_p4 = scmp.ge.s32.totalorder %s14_s15, 4  }
 0x312   :  { %13 = sbr.rel (!%p11_p4) target bundleno = 1 (0x1), region = 75 }

</bundles_post_ra>
